<compile_context>
chip_gen: v7x
topology: tpu7x:2x2x1
jax: 0.10.0
libtpu: 0.0.40
codegen_flags: <defaults>
</compile_context>

<pallas_src>
import numpy as np
import jax
import jax.numpy as jnp
from jax.experimental import pallas as pl
from jax.experimental.pallas import tpu as pltpu

HIDDEN = 50      # true LSTM / GRU hidden size (PyTorch)
CONV_OUT = 64    # Conv1d out_channels
KSIZE = 3        # Conv1d kernel_size (padding=1)

GW = 64          # packed per-gate lane-slot width (HIDDEN=50 padded to 64)
NG = 8 * GW      # 512 packed gate lanes: [i|f] [o|z] [pad|r] [g|n]
COL_I, COL_F = 0 * GW, 1 * GW        # sigmoid group A = [i | f]
COL_O, COL_Z = 2 * GW, 3 * GW        # sigmoid group B = [o | z]
COL_R = 5 * GW                       # sigmoid group C = [pad | r]   (r in HIGH half -> no roll)
COL_G, COL_N = 6 * GW, 7 * GW        # tanh    group D = [g | n]


def _sigmoid(x):
    # exp + approx reciprocal both go to the EUP slot -> off the VALU critical path
    return pl.reciprocal(1.0 + jnp.exp(-x), approx=True)


def model1_kernel(xe_ref, xo_ref, wc_ref, bc_ref, wih_ref, bin_ref,
                  whh_ref, bhhn_ref, wfc_ref, bfc_ref, out_ref):
    T, Bt, S3 = xe_ref.shape

    # ---- Conv1d + ReLU + MaxPool1d(2,2), fused: one matmul per (even/odd) output position ----
    xe = xe_ref[...].reshape(T * Bt, S3)                       # leading-dim merge: free view
    xo = xo_ref[...].reshape(T * Bt, S3)
    wc = wc_ref[...]                                           # (3S, 64) bf16
    ce = jnp.dot(xe, wc, preferred_element_type=jnp.float32)   # conv @ positions 2t
    co = jnp.dot(xo, wc, preferred_element_type=jnp.float32)   # conv @ positions 2t+1
    pooled = jnp.maximum(jnp.maximum(ce, co) + bc_ref[...], 0.0)   # relu(max(.)+b), (T*Bt, 64) f32

    # ---- hoisted input->gate projection, all 7 gates & all steps, one large-M 2-D matmul ----
    gates = (jnp.dot(pooled.astype(jnp.bfloat16), wih_ref[...],
                     preferred_element_type=jnp.float32) + bin_ref[...])   # (T*Bt, NG) f32
    gates = gates.reshape(T, Bt, NG)        # leading-dim split: free; gates[t] is a free view

    whh = whh_ref[...]                      # (128, NG) bf16, block rows [h_lstm | h_gru]
    wfc = wfc_ref[...]                      # (128, 128) bf16
    bhhn = jnp.broadcast_to(bhhn_ref[...], (Bt, 2 * GW))   # [0 | b_hh_n], hoisted out of loop
    lane = jax.lax.broadcasted_iota(jnp.int32, (Bt, 2 * GW), 1)
    low = lane < GW

    h = jnp.zeros((Bt, 2 * GW), jnp.float32)   # [h_lstm | h_gru]  (pad lanes stay exactly 0)
    c = jnp.zeros((Bt, 2 * GW), jnp.float32)   # [c | c] duplicated

    for t in range(T):                          # T is small & static -> fully unrolled
        rec = jnp.dot(h.astype(jnp.bfloat16), whh,
                      preferred_element_type=jnp.float32)                 # (Bt, NG), K=128
        gt = gates[t]
        s = _sigmoid(gt[:, 0:6 * GW] + rec[:, 0:6 * GW])                  # [i|f][o|z][.|r]
        a_if = s[:, 0:2 * GW]                                             # [i | f]
        b_oz = s[:, 2 * GW:4 * GW]                                        # [o | z]
        mult = jnp.where(low, 1.0, s[:, 4 * GW:6 * GW])                   # [1 | r]
        td = jnp.tanh(gt[:, 6 * GW:] + mult * (rec[:, 6 * GW:] + bhhn))   # [g | n]
        p_ = a_if * jnp.where(low, td, c)                                 # [i*g | f*c]
        c = p_ + pltpu.roll(p_, shift=GW, axis=1)                         # [c' | c']
        # low half: h_lstm = o * tanh(c');  high half: h_gru = n + z*(h_gru - n)
        h = jnp.where(low, b_oz * jnp.tanh(c), td + b_oz * (h - td))

    # ---- fc1 on cat([lstm_hn[-1], gru_hn[-1]]); lane-dense (Bt, 128) slab, col 0 = result ----
    out_ref[...] = (jnp.dot(h.astype(jnp.bfloat16), wfc,
                            preferred_element_type=jnp.float32) + bfc_ref[...])


# -------------------- host-side weight packing (gate packing / lane alignment / bf16) --------------------

def prepare_params(p):
    H = HIDDEN
    w_conv = p['w_conv'].reshape(-1, CONV_OUT)          # (3S, 64), im2col row order (k-major)

    wi_l, wh_l, b_l = p['w_ih_l'], p['w_hh_l'], p['b_l']          # LSTM, torch order [i f g o]
    wi_g, wh_g = p['w_ih_g'], p['w_hh_g']                          # GRU,  torch order [r z n]
    bi_g, bh_g = p['b_ih_g'], p['b_hh_g']

    def gate(w, k):
        return w[..., k * H:(k + 1) * H]

    # input -> packed gates  (64, 512)
    w_ih = jnp.zeros((CONV_OUT, NG), jnp.float32)
    w_ih = w_ih.at[:, COL_I:COL_I + H].set(gate(wi_l, 0))
    w_ih = w_ih.at[:, COL_F:COL_F + H].set(gate(wi_l, 1))
    w_ih = w_ih.at[:, COL_G:COL_G + H].set(gate(wi_l, 2))
    w_ih = w_ih.at[:, COL_O:COL_O + H].set(gate(wi_l, 3))
    w_ih = w_ih.at[:, COL_R:COL_R + H].set(gate(wi_g, 0))
    w_ih = w_ih.at[:, COL_Z:COL_Z + H].set(gate(wi_g, 1))
    w_ih = w_ih.at[:, COL_N:COL_N + H].set(gate(wi_g, 2))

    # biases: fold every hh bias except GRU n's (must stay inside the r product)
    b_in = jnp.zeros((1, NG), jnp.float32)
    b_in = b_in.at[:, COL_I:COL_I + H].set(gate(b_l, 0))
    b_in = b_in.at[:, COL_F:COL_F + H].set(gate(b_l, 1))
    b_in = b_in.at[:, COL_G:COL_G + H].set(gate(b_l, 2))
    b_in = b_in.at[:, COL_O:COL_O + H].set(gate(b_l, 3))
    b_in = b_in.at[:, COL_R:COL_R + H].set(gate(bi_g, 0) + gate(bh_g, 0))
    b_in = b_in.at[:, COL_Z:COL_Z + H].set(gate(bi_g, 1) + gate(bh_g, 1))
    b_in = b_in.at[:, COL_N:COL_N + H].set(gate(bi_g, 2))

    # hidden -> packed gates (128, 512); rows 0..49 = h_lstm, rows 64..113 = h_gru
    w_hh = jnp.zeros((2 * GW, NG), jnp.float32)
    w_hh = w_hh.at[0:H, COL_I:COL_I + H].set(gate(wh_l, 0))
    w_hh = w_hh.at[0:H, COL_F:COL_F + H].set(gate(wh_l, 1))
    w_hh = w_hh.at[0:H, COL_G:COL_G + H].set(gate(wh_l, 2))
    w_hh = w_hh.at[0:H, COL_O:COL_O + H].set(gate(wh_l, 3))
    w_hh = w_hh.at[GW:GW + H, COL_R:COL_R + H].set(gate(wh_g, 0))
    w_hh = w_hh.at[GW:GW + H, COL_Z:COL_Z + H].set(gate(wh_g, 1))
    w_hh = w_hh.at[GW:GW + H, COL_N:COL_N + H].set(gate(wh_g, 2))

    # GRU b_hh_n lives in the tanh group's high half
    b_hhn = jnp.zeros((1, 2 * GW), jnp.float32).at[:, GW:GW + H].set(gate(bh_g, 2))

    # fc: lane-dense (128, 128) slab, result in column 0
    w_fc = jnp.zeros((2 * GW, 128), jnp.float32)
    w_fc = w_fc.at[0:H, 0].set(p['w_fc'][0:H, 0])
    w_fc = w_fc.at[GW:GW + H, 0].set(p['w_fc'][H:2 * H, 0])
    b_fc = jnp.zeros((1, 128), jnp.float32).at[0, 0].set(p['b_fc'][0, 0])

    return (w_conv.astype(jnp.bfloat16), p['b_conv'],
            w_ih.astype(jnp.bfloat16), b_in,
            w_hh.astype(jnp.bfloat16), b_hhn,
            w_fc.astype(jnp.bfloat16), b_fc)


# -------------------- wrapper --------------------

def _full_block(arr):
    zeros = (0,) * arr.ndim
    return pl.BlockSpec(arr.shape, lambda b, _z=zeros: _z)


def _round_up(n, m):
    return -(-n // m) * m


def _vmem_limit(b_tile, T, s3):
    x_blk = 2 * 2 * (T * b_tile * s3 * 2)                       # xe/xo bf16, double-buffered
    out_blk = 2 * (b_tile * 128 * 4)
    w_bytes = 2 * ((s3 * CONV_OUT + CONV_OUT * NG + 2 * GW * NG + 128 * 128) * 2
                   + (CONV_OUT + NG + 2 * GW + 128) * 4)
    slabs = T * b_tile * (3 * CONV_OUT + NG) * 4                # conv/pool/gates_in f32
    work = b_tile * NG * 4 * 10                                 # per-step temporaries (rough)
    est = x_blk + out_blk + w_bytes + slabs + work
    return int(min(48 * 1024 * 1024, max(8 * 1024 * 1024, 2 * est)))


def model1_forward(x, p, b_tile=None):
    B, L, S = x.shape
    T = L // 2
    S3 = KSIZE * S

    # host side: conv zero-padding + im2col, split into even/odd output positions (so MaxPool
    # becomes an elementwise max in-kernel), laid out time-major so gates[t] is a free view.
    xp = jnp.pad(x, ((0, 0), (1, 1), (0, 0)))
    xcol = jnp.concatenate([xp[:, 0:L], xp[:, 1:L + 1], xp[:, 2:L + 2]], axis=-1)   # (B, L, 3S)
    xe = jnp.transpose(xcol[:, 0:2 * T:2], (1, 0, 2)).astype(jnp.bfloat16)          # (T, B, 3S)
    xo = jnp.transpose(xcol[:, 1:2 * T:2], (1, 0, 2)).astype(jnp.bfloat16)

    if b_tile is None:
        # >=2 grid steps whenever the batch can usefully be split (keeps both v7x TCs busy);
        # larger tiles for big B amortize the serial recurrence; cap for VMEM headroom.
        b_tile = min(256, max(8, _round_up(pl.cdiv(B, 2), 8)))
    b_tile = max(8, _round_up(b_tile, 8))
    Bp = _round_up(B, b_tile)
    if Bp != B:
        xe = jnp.pad(xe, ((0, 0), (0, Bp - B), (0, 0)))
        xo = jnp.pad(xo, ((0, 0), (0, Bp - B), (0, 0)))
    nb = Bp // b_tile

    weights = prepare_params(p)
    in_specs = [pl.BlockSpec((T, b_tile, S3), lambda b: (0, b, 0)),
                pl.BlockSpec((T, b_tile, S3), lambda b: (0, b, 0))]
    in_specs += [_full_block(w) for w in weights]

    out = pl.pallas_call(
        model1_kernel,
        out_shape=jax.ShapeDtypeStruct((Bp, 128), jnp.float32),   # lane-dense slab, col 0 = result
        grid=(nb,),
        in_specs=in_specs,
        out_specs=pl.BlockSpec((b_tile, 128), lambda b: (b, 0)),
        compiler_params=pltpu.CompilerParams(
            dimension_semantics=("parallel",),
            vmem_limit_bytes=_vmem_limit(b_tile, T, S3)),
    )(xe, xo, *weights)
    return out[:B, :1]


# -------------------- synthetic params + pure-JAX reference (PyTorch semantics) --------------------

def init_params(key, seq):
    ks = jax.random.split(key, 12)

    def u(k, shape, bound):
        return jax.random.uniform(k, shape, jnp.float32, -bound, bound)

    bc = 1.0 / np.sqrt(seq * KSIZE)
    bh = 1.0 / np.sqrt(HIDDEN)
    bf = 1.0 / np.sqrt(2 * HIDDEN)
    return dict(
        w_conv=u(ks[0], (KSIZE, seq, CONV_OUT), bc),     # torch (64, S, 3) transposed
        b_conv=u(ks[1], (1, CONV_OUT), bc),
        w_ih_l=u(ks[2], (CONV_OUT, 4 * HIDDEN), bh),     # torch weight_ih_l0.T, gates [i f g o]
        w_hh_l=u(ks[3], (HIDDEN, 4 * HIDDEN), bh),
        b_l=u(ks[4], (1, 4 * HIDDEN), bh) + u(ks[5], (1, 4 * HIDDEN), bh),  # b_ih + b_hh
        w_ih_g=u(ks[6], (CONV_OUT, 3 * HIDDEN), bh),     # gates [r z n]
        w_hh_g=u(ks[7], (HIDDEN, 3 * HIDDEN), bh),
        b_ih_g=u(ks[8], (1, 3 * HIDDEN), bh),
        b_hh_g=u(ks[9], (1, 3 * HIDDEN), bh),
        w_fc=u(ks[10], (2 * HIDDEN, 1), bf),
        b_fc=u(ks[11], (1, 1), bf),
    )


def reference_forward(x, p):
    B, L, S = x.shape
    T, H = L // 2, HIDDEN
    xp = jnp.pad(x, ((0, 0), (1, 1), (0, 0)))
    conv = sum(jnp.einsum('bls,so->blo', xp[:, k:k + L, :], p['w_conv'][k])
               for k in range(KSIZE))
    conv = jax.nn.relu(conv + p['b_conv'][None])
    pooled = jnp.max(conv[:, :2 * T, :].reshape(B, T, 2, CONV_OUT), axis=2)

    h_l = jnp.zeros((B, H)); c_l = jnp.zeros((B, H)); h_g = jnp.zeros((B, H))
    for t in range(T):
        xt = pooled[:, t]
        gl = xt @ p['w_ih_l'] + h_l @ p['w_hh_l'] + p['b_l']
        i = jax.nn.sigmoid(gl[:, :H]); f = jax.nn.sigmoid(gl[:, H:2 * H])
        g = jnp.tanh(gl[:, 2 * H:3 * H]); o = jax.nn.sigmoid(gl[:, 3 * H:])
        c_l = f * c_l + i * g
        h_l = o * jnp.tanh(c_l)
        gi = xt @ p['w_ih_g'] + p['b_ih_g']
        gh = h_g @ p['w_hh_g'] + p['b_hh_g']
        r = jax.nn.sigmoid(gi[:, :H] + gh[:, :H])
        z = jax.nn.sigmoid(gi[:, H:2 * H] + gh[:, H:2 * H])
        n = jnp.tanh(gi[:, 2 * H:] + r * gh[:, 2 * H:])
        h_g = (1.0 - z) * n + z * h_g
    comb = jnp.concatenate([h_l, h_g], axis=1)
    return comb @ p['w_fc'] + p['b_fc']


if __name__ == "__main__":
    B, L, SEQ = 2, 16, 8          # batch, feature-length, `sequence` (= conv in_channels)
    key = jax.random.PRNGKey(0)
    kx, kp = jax.random.split(key)
    x = jax.random.normal(kx, (B, L, SEQ), jnp.float32)
    params = init_params(kp, SEQ)

    fwd = jax.jit(model1_forward)
    out = fwd(x, params)
    jax.block_until_ready(out)
    assert out.shape == (B, 1)

    ref = reference_forward(x, params)
    # bf16 matmul operands + approx-reciprocal sigmoid -> slightly looser tolerance than pure f32
    np.testing.assert_allclose(np.asarray(out), np.asarray(ref), rtol=5e-2, atol=5e-2)
    print("KERNEL_OK")
</pallas_src>

<mosaic_0001>
module attributes {stable_mosaic.version = 11 : i64} {
  func.func @model1_kernel(%arg0: i32, %arg1: memref<8x8x24xbf16, #tpu.memory_space<vmem>>, %arg2: memref<8x8x24xbf16, #tpu.memory_space<vmem>>, %arg3: memref<24x64xbf16, #tpu.memory_space<vmem>>, %arg4: memref<1x64xf32, #tpu.memory_space<vmem>>, %arg5: memref<64x512xbf16, #tpu.memory_space<vmem>>, %arg6: memref<1x512xf32, #tpu.memory_space<vmem>>, %arg7: memref<128x512xbf16, #tpu.memory_space<vmem>>, %arg8: memref<1x128xf32, #tpu.memory_space<vmem>>, %arg9: memref<128x128xbf16, #tpu.memory_space<vmem>>, %arg10: memref<1x128xf32, #tpu.memory_space<vmem>>, %arg11: memref<8x128xf32, #tpu.memory_space<vmem>>) attributes {dimension_semantics = [#tpu.dimension_semantics<parallel>], iteration_bounds = array<i64: 1>, scalar_prefetch = 0 : i64, scratch_operands = 0 : i64, tpu.core_type = #tpu.core_type<tc>, window_params = [{transform_indices = @transform_0, window_bounds = array<i64: 8, 8, 24>}, {transform_indices = @transform_1, window_bounds = array<i64: 8, 8, 24>}, {pipeline_mode = #tpu.pipeline_mode<synchronous>, transform_indices = @transform_2, window_bounds = array<i64: 24, 64>}, {pipeline_mode = #tpu.pipeline_mode<synchronous>, transform_indices = @transform_3, window_bounds = array<i64: 1, 64>}, {pipeline_mode = #tpu.pipeline_mode<synchronous>, transform_indices = @transform_4, window_bounds = array<i64: 64, 512>}, {pipeline_mode = #tpu.pipeline_mode<synchronous>, transform_indices = @transform_5, window_bounds = array<i64: 1, 512>}, {pipeline_mode = #tpu.pipeline_mode<synchronous>, transform_indices = @transform_6, window_bounds = array<i64: 128, 512>}, {pipeline_mode = #tpu.pipeline_mode<synchronous>, transform_indices = @transform_7, window_bounds = array<i64: 1, 128>}, {pipeline_mode = #tpu.pipeline_mode<synchronous>, transform_indices = @transform_8, window_bounds = array<i64: 128, 128>}, {pipeline_mode = #tpu.pipeline_mode<synchronous>, transform_indices = @transform_9, window_bounds = array<i64: 1, 128>}, {transform_indices = @transform_10, window_bounds = array<i64: 8, 128>}]} {
    %c0 = arith.constant 0 : index
    %c0_0 = arith.constant 0 : index
    %c0_1 = arith.constant 0 : index
    %0 = vector.load %arg1[%c0, %c0_0, %c0_1] : memref<8x8x24xbf16, #tpu.memory_space<vmem>>, vector<8x8x24xbf16>
    %1 = vector.shape_cast %0 : vector<8x8x24xbf16> to vector<64x24xbf16>
    %c0_2 = arith.constant 0 : index
    %c0_3 = arith.constant 0 : index
    %c0_4 = arith.constant 0 : index
    %2 = vector.load %arg2[%c0_2, %c0_3, %c0_4] : memref<8x8x24xbf16, #tpu.memory_space<vmem>>, vector<8x8x24xbf16>
    %3 = vector.shape_cast %2 : vector<8x8x24xbf16> to vector<64x24xbf16>
    %c0_5 = arith.constant 0 : index
    %c0_6 = arith.constant 0 : index
    %4 = vector.load %arg3[%c0_5, %c0_6] : memref<24x64xbf16, #tpu.memory_space<vmem>>, vector<24x64xbf16>
    %cst = arith.constant dense<0.000000e+00> : vector<64x64xf32>
    %5 = tpu.matmul %1, %4, %cst {dimension_numbers = #tpu.dot_dimension_numbers<[1], [0], [0], [1], [0, 0, 1, 1], [], []>} : vector<64x24xbf16>, vector<24x64xbf16>, vector<64x64xf32> -> vector<64x64xf32>
    %cst_7 = arith.constant dense<0.000000e+00> : vector<64x64xf32>
    %6 = tpu.matmul %3, %4, %cst_7 {dimension_numbers = #tpu.dot_dimension_numbers<[1], [0], [0], [1], [0, 0, 1, 1], [], []>} : vector<64x24xbf16>, vector<24x64xbf16>, vector<64x64xf32> -> vector<64x64xf32>
    %7 = arith.maximumf %5, %6 : vector<64x64xf32>
    %c0_8 = arith.constant 0 : index
    %c0_9 = arith.constant 0 : index
    %8 = vector.load %arg4[%c0_8, %c0_9] : memref<1x64xf32, #tpu.memory_space<vmem>>, vector<1x64xf32>
    %9 = vector.broadcast %8 : vector<1x64xf32> to vector<64x64xf32>
    %10 = arith.addf %7, %9 : vector<64x64xf32>
    %cst_10 = arith.constant 0.000000e+00 : f32
    %11 = vector.broadcast %cst_10 : f32 to vector<64x64xf32>
    %12 = arith.maximumf %10, %11 : vector<64x64xf32>
    %13 = arith.truncf %12 : vector<64x64xf32> to vector<64x64xbf16>
    %c0_11 = arith.constant 0 : index
    %c0_12 = arith.constant 0 : index
    %14 = vector.load %arg5[%c0_11, %c0_12] : memref<64x512xbf16, #tpu.memory_space<vmem>>, vector<64x512xbf16>
    %cst_13 = arith.constant dense<0.000000e+00> : vector<64x512xf32>
    %15 = tpu.matmul %13, %14, %cst_13 {dimension_numbers = #tpu.dot_dimension_numbers<[1], [0], [0], [1], [0, 0, 1, 1], [], []>} : vector<64x64xbf16>, vector<64x512xbf16>, vector<64x512xf32> -> vector<64x512xf32>
    %c0_14 = arith.constant 0 : index
    %c0_15 = arith.constant 0 : index
    %16 = vector.load %arg6[%c0_14, %c0_15] : memref<1x512xf32, #tpu.memory_space<vmem>>, vector<1x512xf32>
    %17 = vector.broadcast %16 : vector<1x512xf32> to vector<64x512xf32>
    %18 = arith.addf %15, %17 : vector<64x512xf32>
    %19 = vector.shape_cast %18 : vector<64x512xf32> to vector<8x8x512xf32>
    %c0_16 = arith.constant 0 : index
    %c0_17 = arith.constant 0 : index
    %20 = vector.load %arg7[%c0_16, %c0_17] : memref<128x512xbf16, #tpu.memory_space<vmem>>, vector<128x512xbf16>
    %c0_18 = arith.constant 0 : index
    %c0_19 = arith.constant 0 : index
    %21 = vector.load %arg9[%c0_18, %c0_19] : memref<128x128xbf16, #tpu.memory_space<vmem>>, vector<128x128xbf16>
    %c0_20 = arith.constant 0 : index
    %c0_21 = arith.constant 0 : index
    %22 = vector.load %arg8[%c0_20, %c0_21] : memref<1x128xf32, #tpu.memory_space<vmem>>, vector<1x128xf32>
    %23 = vector.shape_cast %22 : vector<1x128xf32> to vector<1x128xf32>
    %24 = vector.broadcast %23 : vector<1x128xf32> to vector<8x128xf32>
    %25 = tpu.iota {dimensions = array<i32: 1>} : vector<8x128xi32>
    %c64_i32 = arith.constant 64 : i32
    %26 = vector.broadcast %c64_i32 : i32 to vector<8x128xi32>
    %27 = arith.cmpi slt, %25, %26 : vector<8x128xi32>
    %cst_22 = arith.constant 0.000000e+00 : f32
    %28 = vector.broadcast %cst_22 : f32 to vector<8x128xf32>
    %cst_23 = arith.constant 0.000000e+00 : f32
    %29 = vector.broadcast %cst_23 : f32 to vector<8x128xf32>
    %30 = arith.truncf %28 : vector<8x128xf32> to vector<8x128xbf16>
    %cst_24 = arith.constant dense<0.000000e+00> : vector<8x512xf32>
    %31 = tpu.matmul %30, %20, %cst_24 {dimension_numbers = #tpu.dot_dimension_numbers<[1], [0], [0], [1], [0, 0, 1, 1], [], []>} : vector<8x128xbf16>, vector<128x512xbf16>, vector<8x512xf32> -> vector<8x512xf32>
    %32 = vector.extract_strided_slice %19 {offsets = [0, 0, 0], sizes = [1, 8, 512], strides = [1, 1, 1]} : vector<8x8x512xf32> to vector<1x8x512xf32>
    %33 = vector.shape_cast %32 : vector<1x8x512xf32> to vector<8x512xf32>
    %34 = vector.extract_strided_slice %33 {offsets = [0, 0], sizes = [8, 384], strides = [1, 1]} : vector<8x512xf32> to vector<8x384xf32>
    %35 = vector.extract_strided_slice %31 {offsets = [0, 0], sizes = [8, 384], strides = [1, 1]} : vector<8x512xf32> to vector<8x384xf32>
    %36 = arith.addf %34, %35 : vector<8x384xf32>
    %cst_25 = arith.constant 0.000000e+00 : f32
    %37 = vector.broadcast %cst_25 : f32 to vector<8x384xf32>
    %38 = arith.subf %37, %36 : vector<8x384xf32>
    %39 = math.exp %38 : vector<8x384xf32>
    %cst_26 = arith.constant 1.000000e+00 : f32
    %40 = vector.broadcast %cst_26 : f32 to vector<8x384xf32>
    %41 = arith.addf %40, %39 : vector<8x384xf32>
    %42 = tpu.reciprocal %41 {approx = true} : vector<8x384xf32> -> vector<8x384xf32>
    %43 = vector.extract_strided_slice %42 {offsets = [0, 0], sizes = [8, 128], strides = [1, 1]} : vector<8x384xf32> to vector<8x128xf32>
    %44 = vector.extract_strided_slice %42 {offsets = [0, 128], sizes = [8, 128], strides = [1, 1]} : vector<8x384xf32> to vector<8x128xf32>
    %45 = vector.extract_strided_slice %42 {offsets = [0, 256], sizes = [8, 128], strides = [1, 1]} : vector<8x384xf32> to vector<8x128xf32>
    %cst_27 = arith.constant 1.000000e+00 : f32
    %46 = vector.broadcast %cst_27 : f32 to vector<8x128xf32>
    %47 = arith.select %27, %46, %45 : vector<8x128xi1>, vector<8x128xf32>
    %48 = vector.extract_strided_slice %33 {offsets = [0, 384], sizes = [8, 128], strides = [1, 1]} : vector<8x512xf32> to vector<8x128xf32>
    %49 = vector.extract_strided_slice %31 {offsets = [0, 384], sizes = [8, 128], strides = [1, 1]} : vector<8x512xf32> to vector<8x128xf32>
    %50 = arith.addf %49, %24 : vector<8x128xf32>
    %51 = arith.mulf %47, %50 : vector<8x128xf32>
    %52 = arith.addf %48, %51 : vector<8x128xf32>
    %53 = math.tanh %52 : vector<8x128xf32>
    %54 = arith.select %27, %53, %29 : vector<8x128xi1>, vector<8x128xf32>
    %55 = arith.mulf %43, %54 : vector<8x128xf32>
    %c64_i32_28 = arith.constant 64 : i32
    %56 = tpu.dynamic_rotate %55 by %c64_i32_28 dim 1 : vector<8x128xf32>, i32 -> vector<8x128xf32>
    %57 = arith.addf %55, %56 : vector<8x128xf32>
    %58 = math.tanh %57 : vector<8x128xf32>
    %59 = arith.mulf %44, %58 : vector<8x128xf32>
    %60 = arith.subf %28, %53 : vector<8x128xf32>
    %61 = arith.mulf %44, %60 : vector<8x128xf32>
    %62 = arith.addf %53, %61 : vector<8x128xf32>
    %63 = arith.select %27, %59, %62 : vector<8x128xi1>, vector<8x128xf32>
    %64 = arith.truncf %63 : vector<8x128xf32> to vector<8x128xbf16>
    %cst_29 = arith.constant dense<0.000000e+00> : vector<8x512xf32>
    %65 = tpu.matmul %64, %20, %cst_29 {dimension_numbers = #tpu.dot_dimension_numbers<[1], [0], [0], [1], [0, 0, 1, 1], [], []>} : vector<8x128xbf16>, vector<128x512xbf16>, vector<8x512xf32> -> vector<8x512xf32>
    %66 = vector.extract_strided_slice %19 {offsets = [1, 0, 0], sizes = [1, 8, 512], strides = [1, 1, 1]} : vector<8x8x512xf32> to vector<1x8x512xf32>
    %67 = vector.shape_cast %66 : vector<1x8x512xf32> to vector<8x512xf32>
    %68 = vector.extract_strided_slice %67 {offsets = [0, 0], sizes = [8, 384], strides = [1, 1]} : vector<8x512xf32> to vector<8x384xf32>
    %69 = vector.extract_strided_slice %65 {offsets = [0, 0], sizes = [8, 384], strides = [1, 1]} : vector<8x512xf32> to vector<8x384xf32>
    %70 = arith.addf %68, %69 : vector<8x384xf32>
    %cst_30 = arith.constant 0.000000e+00 : f32
    %71 = vector.broadcast %cst_30 : f32 to vector<8x384xf32>
    %72 = arith.subf %71, %70 : vector<8x384xf32>
    %73 = math.exp %72 : vector<8x384xf32>
    %cst_31 = arith.constant 1.000000e+00 : f32
    %74 = vector.broadcast %cst_31 : f32 to vector<8x384xf32>
    %75 = arith.addf %74, %73 : vector<8x384xf32>
    %76 = tpu.reciprocal %75 {approx = true} : vector<8x384xf32> -> vector<8x384xf32>
    %77 = vector.extract_strided_slice %76 {offsets = [0, 0], sizes = [8, 128], strides = [1, 1]} : vector<8x384xf32> to vector<8x128xf32>
    %78 = vector.extract_strided_slice %76 {offsets = [0, 128], sizes = [8, 128], strides = [1, 1]} : vector<8x384xf32> to vector<8x128xf32>
    %79 = vector.extract_strided_slice %76 {offsets = [0, 256], sizes = [8, 128], strides = [1, 1]} : vector<8x384xf32> to vector<8x128xf32>
    %cst_32 = arith.constant 1.000000e+00 : f32
    %80 = vector.broadcast %cst_32 : f32 to vector<8x128xf32>
    %81 = arith.select %27, %80, %79 : vector<8x128xi1>, vector<8x128xf32>
    %82 = vector.extract_strided_slice %67 {offsets = [0, 384], sizes = [8, 128], strides = [1, 1]} : vector<8x512xf32> to vector<8x128xf32>
    %83 = vector.extract_strided_slice %65 {offsets = [0, 384], sizes = [8, 128], strides = [1, 1]} : vector<8x512xf32> to vector<8x128xf32>
    %84 = arith.addf %83, %24 : vector<8x128xf32>
    %85 = arith.mulf %81, %84 : vector<8x128xf32>
    %86 = arith.addf %82, %85 : vector<8x128xf32>
    %87 = math.tanh %86 : vector<8x128xf32>
    %88 = arith.select %27, %87, %57 : vector<8x128xi1>, vector<8x128xf32>
    %89 = arith.mulf %77, %88 : vector<8x128xf32>
    %c64_i32_33 = arith.constant 64 : i32
    %90 = tpu.dynamic_rotate %89 by %c64_i32_33 dim 1 : vector<8x128xf32>, i32 -> vector<8x128xf32>
    %91 = arith.addf %89, %90 : vector<8x128xf32>
    %92 = math.tanh %91 : vector<8x128xf32>
    %93 = arith.mulf %78, %92 : vector<8x128xf32>
    %94 = arith.subf %63, %87 : vector<8x128xf32>
    %95 = arith.mulf %78, %94 : vector<8x128xf32>
    %96 = arith.addf %87, %95 : vector<8x128xf32>
    %97 = arith.select %27, %93, %96 : vector<8x128xi1>, vector<8x128xf32>
    %98 = arith.truncf %97 : vector<8x128xf32> to vector<8x128xbf16>
    %cst_34 = arith.constant dense<0.000000e+00> : vector<8x512xf32>
    %99 = tpu.matmul %98, %20, %cst_34 {dimension_numbers = #tpu.dot_dimension_numbers<[1], [0], [0], [1], [0, 0, 1, 1], [], []>} : vector<8x128xbf16>, vector<128x512xbf16>, vector<8x512xf32> -> vector<8x512xf32>
    %100 = vector.extract_strided_slice %19 {offsets = [2, 0, 0], sizes = [1, 8, 512], strides = [1, 1, 1]} : vector<8x8x512xf32> to vector<1x8x512xf32>
    %101 = vector.shape_cast %100 : vector<1x8x512xf32> to vector<8x512xf32>
    %102 = vector.extract_strided_slice %101 {offsets = [0, 0], sizes = [8, 384], strides = [1, 1]} : vector<8x512xf32> to vector<8x384xf32>
    %103 = vector.extract_strided_slice %99 {offsets = [0, 0], sizes = [8, 384], strides = [1, 1]} : vector<8x512xf32> to vector<8x384xf32>
    %104 = arith.addf %102, %103 : vector<8x384xf32>
    %cst_35 = arith.constant 0.000000e+00 : f32
    %105 = vector.broadcast %cst_35 : f32 to vector<8x384xf32>
    %106 = arith.subf %105, %104 : vector<8x384xf32>
    %107 = math.exp %106 : vector<8x384xf32>
    %cst_36 = arith.constant 1.000000e+00 : f32
    %108 = vector.broadcast %cst_36 : f32 to vector<8x384xf32>
    %109 = arith.addf %108, %107 : vector<8x384xf32>
    %110 = tpu.reciprocal %109 {approx = true} : vector<8x384xf32> -> vector<8x384xf32>
    %111 = vector.extract_strided_slice %110 {offsets = [0, 0], sizes = [8, 128], strides = [1, 1]} : vector<8x384xf32> to vector<8x128xf32>
    %112 = vector.extract_strided_slice %110 {offsets = [0, 128], sizes = [8, 128], strides = [1, 1]} : vector<8x384xf32> to vector<8x128xf32>
    %113 = vector.extract_strided_slice %110 {offsets = [0, 256], sizes = [8, 128], strides = [1, 1]} : vector<8x384xf32> to vector<8x128xf32>
    %cst_37 = arith.constant 1.000000e+00 : f32
    %114 = vector.broadcast %cst_37 : f32 to vector<8x128xf32>
    %115 = arith.select %27, %114, %113 : vector<8x128xi1>, vector<8x128xf32>
    %116 = vector.extract_strided_slice %101 {offsets = [0, 384], sizes = [8, 128], strides = [1, 1]} : vector<8x512xf32> to vector<8x128xf32>
    %117 = vector.extract_strided_slice %99 {offsets = [0, 384], sizes = [8, 128], strides = [1, 1]} : vector<8x512xf32> to vector<8x128xf32>
    %118 = arith.addf %117, %24 : vector<8x128xf32>
    %119 = arith.mulf %115, %118 : vector<8x128xf32>
    %120 = arith.addf %116, %119 : vector<8x128xf32>
    %121 = math.tanh %120 : vector<8x128xf32>
    %122 = arith.select %27, %121, %91 : vector<8x128xi1>, vector<8x128xf32>
    %123 = arith.mulf %111, %122 : vector<8x128xf32>
    %c64_i32_38 = arith.constant 64 : i32
    %124 = tpu.dynamic_rotate %123 by %c64_i32_38 dim 1 : vector<8x128xf32>, i32 -> vector<8x128xf32>
    %125 = arith.addf %123, %124 : vector<8x128xf32>
    %126 = math.tanh %125 : vector<8x128xf32>
    %127 = arith.mulf %112, %126 : vector<8x128xf32>
    %128 = arith.subf %97, %121 : vector<8x128xf32>
    %129 = arith.mulf %112, %128 : vector<8x128xf32>
    %130 = arith.addf %121, %129 : vector<8x128xf32>
    %131 = arith.select %27, %127, %130 : vector<8x128xi1>, vector<8x128xf32>
    %132 = arith.truncf %131 : vector<8x128xf32> to vector<8x128xbf16>
    %cst_39 = arith.constant dense<0.000000e+00> : vector<8x512xf32>
    %133 = tpu.matmul %132, %20, %cst_39 {dimension_numbers = #tpu.dot_dimension_numbers<[1], [0], [0], [1], [0, 0, 1, 1], [], []>} : vector<8x128xbf16>, vector<128x512xbf16>, vector<8x512xf32> -> vector<8x512xf32>
    %134 = vector.extract_strided_slice %19 {offsets = [3, 0, 0], sizes = [1, 8, 512], strides = [1, 1, 1]} : vector<8x8x512xf32> to vector<1x8x512xf32>
    %135 = vector.shape_cast %134 : vector<1x8x512xf32> to vector<8x512xf32>
    %136 = vector.extract_strided_slice %135 {offsets = [0, 0], sizes = [8, 384], strides = [1, 1]} : vector<8x512xf32> to vector<8x384xf32>
    %137 = vector.extract_strided_slice %133 {offsets = [0, 0], sizes = [8, 384], strides = [1, 1]} : vector<8x512xf32> to vector<8x384xf32>
    %138 = arith.addf %136, %137 : vector<8x384xf32>
    %cst_40 = arith.constant 0.000000e+00 : f32
    %139 = vector.broadcast %cst_40 : f32 to vector<8x384xf32>
    %140 = arith.subf %139, %138 : vector<8x384xf32>
    %141 = math.exp %140 : vector<8x384xf32>
    %cst_41 = arith.constant 1.000000e+00 : f32
    %142 = vector.broadcast %cst_41 : f32 to vector<8x384xf32>
    %143 = arith.addf %142, %141 : vector<8x384xf32>
    %144 = tpu.reciprocal %143 {approx = true} : vector<8x384xf32> -> vector<8x384xf32>
    %145 = vector.extract_strided_slice %144 {offsets = [0, 0], sizes = [8, 128], strides = [1, 1]} : vector<8x384xf32> to vector<8x128xf32>
    %146 = vector.extract_strided_slice %144 {offsets = [0, 128], sizes = [8, 128], strides = [1, 1]} : vector<8x384xf32> to vector<8x128xf32>
    %147 = vector.extract_strided_slice %144 {offsets = [0, 256], sizes = [8, 128], strides = [1, 1]} : vector<8x384xf32> to vector<8x128xf32>
    %cst_42 = arith.constant 1.000000e+00 : f32
    %148 = vector.broadcast %cst_42 : f32 to vector<8x128xf32>
    %149 = arith.select %27, %148, %147 : vector<8x128xi1>, vector<8x128xf32>
    %150 = vector.extract_strided_slice %135 {offsets = [0, 384], sizes = [8, 128], strides = [1, 1]} : vector<8x512xf32> to vector<8x128xf32>
    %151 = vector.extract_strided_slice %133 {offsets = [0, 384], sizes = [8, 128], strides = [1, 1]} : vector<8x512xf32> to vector<8x128xf32>
    %152 = arith.addf %151, %24 : vector<8x128xf32>
    %153 = arith.mulf %149, %152 : vector<8x128xf32>
    %154 = arith.addf %150, %153 : vector<8x128xf32>
    %155 = math.tanh %154 : vector<8x128xf32>
    %156 = arith.select %27, %155, %125 : vector<8x128xi1>, vector<8x128xf32>
    %157 = arith.mulf %145, %156 : vector<8x128xf32>
    %c64_i32_43 = arith.constant 64 : i32
    %158 = tpu.dynamic_rotate %157 by %c64_i32_43 dim 1 : vector<8x128xf32>, i32 -> vector<8x128xf32>
    %159 = arith.addf %157, %158 : vector<8x128xf32>
    %160 = math.tanh %159 : vector<8x128xf32>
    %161 = arith.mulf %146, %160 : vector<8x128xf32>
    %162 = arith.subf %131, %155 : vector<8x128xf32>
    %163 = arith.mulf %146, %162 : vector<8x128xf32>
    %164 = arith.addf %155, %163 : vector<8x128xf32>
    %165 = arith.select %27, %161, %164 : vector<8x128xi1>, vector<8x128xf32>
    %166 = arith.truncf %165 : vector<8x128xf32> to vector<8x128xbf16>
    %cst_44 = arith.constant dense<0.000000e+00> : vector<8x512xf32>
    %167 = tpu.matmul %166, %20, %cst_44 {dimension_numbers = #tpu.dot_dimension_numbers<[1], [0], [0], [1], [0, 0, 1, 1], [], []>} : vector<8x128xbf16>, vector<128x512xbf16>, vector<8x512xf32> -> vector<8x512xf32>
    %168 = vector.extract_strided_slice %19 {offsets = [4, 0, 0], sizes = [1, 8, 512], strides = [1, 1, 1]} : vector<8x8x512xf32> to vector<1x8x512xf32>
    %169 = vector.shape_cast %168 : vector<1x8x512xf32> to vector<8x512xf32>
    %170 = vector.extract_strided_slice %169 {offsets = [0, 0], sizes = [8, 384], strides = [1, 1]} : vector<8x512xf32> to vector<8x384xf32>
    %171 = vector.extract_strided_slice %167 {offsets = [0, 0], sizes = [8, 384], strides = [1, 1]} : vector<8x512xf32> to vector<8x384xf32>
    %172 = arith.addf %170, %171 : vector<8x384xf32>
    %cst_45 = arith.constant 0.000000e+00 : f32
    %173 = vector.broadcast %cst_45 : f32 to vector<8x384xf32>
    %174 = arith.subf %173, %172 : vector<8x384xf32>
    %175 = math.exp %174 : vector<8x384xf32>
    %cst_46 = arith.constant 1.000000e+00 : f32
    %176 = vector.broadcast %cst_46 : f32 to vector<8x384xf32>
    %177 = arith.addf %176, %175 : vector<8x384xf32>
    %178 = tpu.reciprocal %177 {approx = true} : vector<8x384xf32> -> vector<8x384xf32>
    %179 = vector.extract_strided_slice %178 {offsets = [0, 0], sizes = [8, 128], strides = [1, 1]} : vector<8x384xf32> to vector<8x128xf32>
    %180 = vector.extract_strided_slice %178 {offsets = [0, 128], sizes = [8, 128], strides = [1, 1]} : vector<8x384xf32> to vector<8x128xf32>
    %181 = vector.extract_strided_slice %178 {offsets = [0, 256], sizes = [8, 128], strides = [1, 1]} : vector<8x384xf32> to vector<8x128xf32>
    %cst_47 = arith.constant 1.000000e+00 : f32
    %182 = vector.broadcast %cst_47 : f32 to vector<8x128xf32>
    %183 = arith.select %27, %182, %181 : vector<8x128xi1>, vector<8x128xf32>
    %184 = vector.extract_strided_slice %169 {offsets = [0, 384], sizes = [8, 128], strides = [1, 1]} : vector<8x512xf32> to vector<8x128xf32>
    %185 = vector.extract_strided_slice %167 {offsets = [0, 384], sizes = [8, 128], strides = [1, 1]} : vector<8x512xf32> to vector<8x128xf32>
    %186 = arith.addf %185, %24 : vector<8x128xf32>
    %187 = arith.mulf %183, %186 : vector<8x128xf32>
    %188 = arith.addf %184, %187 : vector<8x128xf32>
    %189 = math.tanh %188 : vector<8x128xf32>
    %190 = arith.select %27, %189, %159 : vector<8x128xi1>, vector<8x128xf32>
    %191 = arith.mulf %179, %190 : vector<8x128xf32>
    %c64_i32_48 = arith.constant 64 : i32
    %192 = tpu.dynamic_rotate %191 by %c64_i32_48 dim 1 : vector<8x128xf32>, i32 -> vector<8x128xf32>
    %193 = arith.addf %191, %192 : vector<8x128xf32>
    %194 = math.tanh %193 : vector<8x128xf32>
    %195 = arith.mulf %180, %194 : vector<8x128xf32>
    %196 = arith.subf %165, %189 : vector<8x128xf32>
    %197 = arith.mulf %180, %196 : vector<8x128xf32>
    %198 = arith.addf %189, %197 : vector<8x128xf32>
    %199 = arith.select %27, %195, %198 : vector<8x128xi1>, vector<8x128xf32>
    %200 = arith.truncf %199 : vector<8x128xf32> to vector<8x128xbf16>
    %cst_49 = arith.constant dense<0.000000e+00> : vector<8x512xf32>
    %201 = tpu.matmul %200, %20, %cst_49 {dimension_numbers = #tpu.dot_dimension_numbers<[1], [0], [0], [1], [0, 0, 1, 1], [], []>} : vector<8x128xbf16>, vector<128x512xbf16>, vector<8x512xf32> -> vector<8x512xf32>
    %202 = vector.extract_strided_slice %19 {offsets = [5, 0, 0], sizes = [1, 8, 512], strides = [1, 1, 1]} : vector<8x8x512xf32> to vector<1x8x512xf32>
    %203 = vector.shape_cast %202 : vector<1x8x512xf32> to vector<8x512xf32>
    %204 = vector.extract_strided_slice %203 {offsets = [0, 0], sizes = [8, 384], strides = [1, 1]} : vector<8x512xf32> to vector<8x384xf32>
    %205 = vector.extract_strided_slice %201 {offsets = [0, 0], sizes = [8, 384], strides = [1, 1]} : vector<8x512xf32> to vector<8x384xf32>
    %206 = arith.addf %204, %205 : vector<8x384xf32>
    %cst_50 = arith.constant 0.000000e+00 : f32
    %207 = vector.broadcast %cst_50 : f32 to vector<8x384xf32>
    %208 = arith.subf %207, %206 : vector<8x384xf32>
    %209 = math.exp %208 : vector<8x384xf32>
    %cst_51 = arith.constant 1.000000e+00 : f32
    %210 = vector.broadcast %cst_51 : f32 to vector<8x384xf32>
    %211 = arith.addf %210, %209 : vector<8x384xf32>
    %212 = tpu.reciprocal %211 {approx = true} : vector<8x384xf32> -> vector<8x384xf32>
    %213 = vector.extract_strided_slice %212 {offsets = [0, 0], sizes = [8, 128], strides = [1, 1]} : vector<8x384xf32> to vector<8x128xf32>
    %214 = vector.extract_strided_slice %212 {offsets = [0, 128], sizes = [8, 128], strides = [1, 1]} : vector<8x384xf32> to vector<8x128xf32>
    %215 = vector.extract_strided_slice %212 {offsets = [0, 256], sizes = [8, 128], strides = [1, 1]} : vector<8x384xf32> to vector<8x128xf32>
    %cst_52 = arith.constant 1.000000e+00 : f32
    %216 = vector.broadcast %cst_52 : f32 to vector<8x128xf32>
    %217 = arith.select %27, %216, %215 : vector<8x128xi1>, vector<8x128xf32>
    %218 = vector.extract_strided_slice %203 {offsets = [0, 384], sizes = [8, 128], strides = [1, 1]} : vector<8x512xf32> to vector<8x128xf32>
    %219 = vector.extract_strided_slice %201 {offsets = [0, 384], sizes = [8, 128], strides = [1, 1]} : vector<8x512xf32> to vector<8x128xf32>
    %220 = arith.addf %219, %24 : vector<8x128xf32>
    %221 = arith.mulf %217, %220 : vector<8x128xf32>
    %222 = arith.addf %218, %221 : vector<8x128xf32>
    %223 = math.tanh %222 : vector<8x128xf32>
    %224 = arith.select %27, %223, %193 : vector<8x128xi1>, vector<8x128xf32>
    %225 = arith.mulf %213, %224 : vector<8x128xf32>
    %c64_i32_53 = arith.constant 64 : i32
    %226 = tpu.dynamic_rotate %225 by %c64_i32_53 dim 1 : vector<8x128xf32>, i32 -> vector<8x128xf32>
    %227 = arith.addf %225, %226 : vector<8x128xf32>
    %228 = math.tanh %227 : vector<8x128xf32>
    %229 = arith.mulf %214, %228 : vector<8x128xf32>
    %230 = arith.subf %199, %223 : vector<8x128xf32>
    %231 = arith.mulf %214, %230 : vector<8x128xf32>
    %232 = arith.addf %223, %231 : vector<8x128xf32>
    %233 = arith.select %27, %229, %232 : vector<8x128xi1>, vector<8x128xf32>
    %234 = arith.truncf %233 : vector<8x128xf32> to vector<8x128xbf16>
    %cst_54 = arith.constant dense<0.000000e+00> : vector<8x512xf32>
    %235 = tpu.matmul %234, %20, %cst_54 {dimension_numbers = #tpu.dot_dimension_numbers<[1], [0], [0], [1], [0, 0, 1, 1], [], []>} : vector<8x128xbf16>, vector<128x512xbf16>, vector<8x512xf32> -> vector<8x512xf32>
    %236 = vector.extract_strided_slice %19 {offsets = [6, 0, 0], sizes = [1, 8, 512], strides = [1, 1, 1]} : vector<8x8x512xf32> to vector<1x8x512xf32>
    %237 = vector.shape_cast %236 : vector<1x8x512xf32> to vector<8x512xf32>
    %238 = vector.extract_strided_slice %237 {offsets = [0, 0], sizes = [8, 384], strides = [1, 1]} : vector<8x512xf32> to vector<8x384xf32>
    %239 = vector.extract_strided_slice %235 {offsets = [0, 0], sizes = [8, 384], strides = [1, 1]} : vector<8x512xf32> to vector<8x384xf32>
    %240 = arith.addf %238, %239 : vector<8x384xf32>
    %cst_55 = arith.constant 0.000000e+00 : f32
    %241 = vector.broadcast %cst_55 : f32 to vector<8x384xf32>
    %242 = arith.subf %241, %240 : vector<8x384xf32>
    %243 = math.exp %242 : vector<8x384xf32>
    %cst_56 = arith.constant 1.000000e+00 : f32
    %244 = vector.broadcast %cst_56 : f32 to vector<8x384xf32>
    %245 = arith.addf %244, %243 : vector<8x384xf32>
    %246 = tpu.reciprocal %245 {approx = true} : vector<8x384xf32> -> vector<8x384xf32>
    %247 = vector.extract_strided_slice %246 {offsets = [0, 0], sizes = [8, 128], strides = [1, 1]} : vector<8x384xf32> to vector<8x128xf32>
    %248 = vector.extract_strided_slice %246 {offsets = [0, 128], sizes = [8, 128], strides = [1, 1]} : vector<8x384xf32> to vector<8x128xf32>
    %249 = vector.extract_strided_slice %246 {offsets = [0, 256], sizes = [8, 128], strides = [1, 1]} : vector<8x384xf32> to vector<8x128xf32>
    %cst_57 = arith.constant 1.000000e+00 : f32
    %250 = vector.broadcast %cst_57 : f32 to vector<8x128xf32>
    %251 = arith.select %27, %250, %249 : vector<8x128xi1>, vector<8x128xf32>
    %252 = vector.extract_strided_slice %237 {offsets = [0, 384], sizes = [8, 128], strides = [1, 1]} : vector<8x512xf32> to vector<8x128xf32>
    %253 = vector.extract_strided_slice %235 {offsets = [0, 384], sizes = [8, 128], strides = [1, 1]} : vector<8x512xf32> to vector<8x128xf32>
    %254 = arith.addf %253, %24 : vector<8x128xf32>
    %255 = arith.mulf %251, %254 : vector<8x128xf32>
    %256 = arith.addf %252, %255 : vector<8x128xf32>
    %257 = math.tanh %256 : vector<8x128xf32>
    %258 = arith.select %27, %257, %227 : vector<8x128xi1>, vector<8x128xf32>
    %259 = arith.mulf %247, %258 : vector<8x128xf32>
    %c64_i32_58 = arith.constant 64 : i32
    %260 = tpu.dynamic_rotate %259 by %c64_i32_58 dim 1 : vector<8x128xf32>, i32 -> vector<8x128xf32>
    %261 = arith.addf %259, %260 : vector<8x128xf32>
    %262 = math.tanh %261 : vector<8x128xf32>
    %263 = arith.mulf %248, %262 : vector<8x128xf32>
    %264 = arith.subf %233, %257 : vector<8x128xf32>
    %265 = arith.mulf %248, %264 : vector<8x128xf32>
    %266 = arith.addf %257, %265 : vector<8x128xf32>
    %267 = arith.select %27, %263, %266 : vector<8x128xi1>, vector<8x128xf32>
    %268 = arith.truncf %267 : vector<8x128xf32> to vector<8x128xbf16>
    %cst_59 = arith.constant dense<0.000000e+00> : vector<8x512xf32>
    %269 = tpu.matmul %268, %20, %cst_59 {dimension_numbers = #tpu.dot_dimension_numbers<[1], [0], [0], [1], [0, 0, 1, 1], [], []>} : vector<8x128xbf16>, vector<128x512xbf16>, vector<8x512xf32> -> vector<8x512xf32>
    %270 = vector.extract_strided_slice %19 {offsets = [7, 0, 0], sizes = [1, 8, 512], strides = [1, 1, 1]} : vector<8x8x512xf32> to vector<1x8x512xf32>
    %271 = vector.shape_cast %270 : vector<1x8x512xf32> to vector<8x512xf32>
    %272 = vector.extract_strided_slice %271 {offsets = [0, 0], sizes = [8, 384], strides = [1, 1]} : vector<8x512xf32> to vector<8x384xf32>
    %273 = vector.extract_strided_slice %269 {offsets = [0, 0], sizes = [8, 384], strides = [1, 1]} : vector<8x512xf32> to vector<8x384xf32>
    %274 = arith.addf %272, %273 : vector<8x384xf32>
    %cst_60 = arith.constant 0.000000e+00 : f32
    %275 = vector.broadcast %cst_60 : f32 to vector<8x384xf32>
    %276 = arith.subf %275, %274 : vector<8x384xf32>
    %277 = math.exp %276 : vector<8x384xf32>
    %cst_61 = arith.constant 1.000000e+00 : f32
    %278 = vector.broadcast %cst_61 : f32 to vector<8x384xf32>
    %279 = arith.addf %278, %277 : vector<8x384xf32>
    %280 = tpu.reciprocal %279 {approx = true} : vector<8x384xf32> -> vector<8x384xf32>
    %281 = vector.extract_strided_slice %280 {offsets = [0, 0], sizes = [8, 128], strides = [1, 1]} : vector<8x384xf32> to vector<8x128xf32>
    %282 = vector.extract_strided_slice %280 {offsets = [0, 128], sizes = [8, 128], strides = [1, 1]} : vector<8x384xf32> to vector<8x128xf32>
    %283 = vector.extract_strided_slice %280 {offsets = [0, 256], sizes = [8, 128], strides = [1, 1]} : vector<8x384xf32> to vector<8x128xf32>
    %cst_62 = arith.constant 1.000000e+00 : f32
    %284 = vector.broadcast %cst_62 : f32 to vector<8x128xf32>
    %285 = arith.select %27, %284, %283 : vector<8x128xi1>, vector<8x128xf32>
    %286 = vector.extract_strided_slice %271 {offsets = [0, 384], sizes = [8, 128], strides = [1, 1]} : vector<8x512xf32> to vector<8x128xf32>
    %287 = vector.extract_strided_slice %269 {offsets = [0, 384], sizes = [8, 128], strides = [1, 1]} : vector<8x512xf32> to vector<8x128xf32>
    %288 = arith.addf %287, %24 : vector<8x128xf32>
    %289 = arith.mulf %285, %288 : vector<8x128xf32>
    %290 = arith.addf %286, %289 : vector<8x128xf32>
    %291 = math.tanh %290 : vector<8x128xf32>
    %292 = arith.select %27, %291, %261 : vector<8x128xi1>, vector<8x128xf32>
    %293 = arith.mulf %281, %292 : vector<8x128xf32>
    %c64_i32_63 = arith.constant 64 : i32
    %294 = tpu.dynamic_rotate %293 by %c64_i32_63 dim 1 : vector<8x128xf32>, i32 -> vector<8x128xf32>
    %295 = arith.addf %293, %294 : vector<8x128xf32>
    %296 = math.tanh %295 : vector<8x128xf32>
    %297 = arith.mulf %282, %296 : vector<8x128xf32>
    %298 = arith.subf %267, %291 : vector<8x128xf32>
    %299 = arith.mulf %282, %298 : vector<8x128xf32>
    %300 = arith.addf %291, %299 : vector<8x128xf32>
    %301 = arith.select %27, %297, %300 : vector<8x128xi1>, vector<8x128xf32>
    %302 = arith.truncf %301 : vector<8x128xf32> to vector<8x128xbf16>
    %cst_64 = arith.constant dense<0.000000e+00> : vector<8x128xf32>
    %303 = tpu.matmul %302, %21, %cst_64 {dimension_numbers = #tpu.dot_dimension_numbers<[1], [0], [0], [1], [0, 0, 1, 1], [], []>} : vector<8x128xbf16>, vector<128x128xbf16>, vector<8x128xf32> -> vector<8x128xf32>
    %c0_65 = arith.constant 0 : index
    %c0_66 = arith.constant 0 : index
    %304 = vector.load %arg10[%c0_65, %c0_66] : memref<1x128xf32, #tpu.memory_space<vmem>>, vector<1x128xf32>
    %305 = vector.broadcast %304 : vector<1x128xf32> to vector<8x128xf32>
    %306 = arith.addf %303, %305 : vector<8x128xf32>
    %c0_67 = arith.constant 0 : index
    %c0_68 = arith.constant 0 : index
    %307 = vector.load %arg11[%c0_67, %c0_68] : memref<8x128xf32, #tpu.memory_space<vmem>>, vector<8x128xf32>
    tpu.vector_store %arg11[%c0_67, %c0_68], %306 {strides = array<i32>} : memref<8x128xf32, #tpu.memory_space<vmem>>, vector<8x128xf32>,
    return
  }
  func.func @transform_0(%arg0: i32) -> (i32, i32, i32) {
    %c0_i32 = arith.constant 0 : i32
    %c0_i32_0 = arith.constant 0 : i32
    %c0_i32_1 = arith.constant 0 : i32
    return %c0_i32, %arg0, %c0_i32_0 : i32, i32, i32
  }
  func.func @transform_1(%arg0: i32) -> (i32, i32, i32) {
    %c0_i32 = arith.constant 0 : i32
    %c0_i32_0 = arith.constant 0 : i32
    %c0_i32_1 = arith.constant 0 : i32
    return %c0_i32, %arg0, %c0_i32_0 : i32, i32, i32
  }
  func.func @transform_2(%arg0: i32) -> (i32, i32) {
    %c0_i32 = arith.constant 0 : i32
    %c0_i32_0 = arith.constant 0 : i32
    %c0_i32_1 = arith.constant 0 : i32
    return %c0_i32, %c0_i32_0 : i32, i32
  }
  func.func @transform_3(%arg0: i32) -> (i32, i32) {
    %c0_i32 = arith.constant 0 : i32
    %c0_i32_0 = arith.constant 0 : i32
    %c0_i32_1 = arith.constant 0 : i32
    return %c0_i32, %c0_i32_0 : i32, i32
  }
  func.func @transform_4(%arg0: i32) -> (i32, i32) {
    %c0_i32 = arith.constant 0 : i32
    %c0_i32_0 = arith.constant 0 : i32
    %c0_i32_1 = arith.constant 0 : i32
    return %c0_i32, %c0_i32_0 : i32, i32
  }
  func.func @transform_5(%arg0: i32) -> (i32, i32) {
    %c0_i32 = arith.constant 0 : i32
    %c0_i32_0 = arith.constant 0 : i32
    %c0_i32_1 = arith.constant 0 : i32
    return %c0_i32, %c0_i32_0 : i32, i32
  }
  func.func @transform_6(%arg0: i32) -> (i32, i32) {
    %c0_i32 = arith.constant 0 : i32
    %c0_i32_0 = arith.constant 0 : i32
    %c0_i32_1 = arith.constant 0 : i32
    return %c0_i32, %c0_i32_0 : i32, i32
  }
  func.func @transform_7(%arg0: i32) -> (i32, i32) {
    %c0_i32 = arith.constant 0 : i32
    %c0_i32_0 = arith.constant 0 : i32
    %c0_i32_1 = arith.constant 0 : i32
    return %c0_i32, %c0_i32_0 : i32, i32
  }
  func.func @transform_8(%arg0: i32) -> (i32, i32) {
    %c0_i32 = arith.constant 0 : i32
    %c0_i32_0 = arith.constant 0 : i32
    %c0_i32_1 = arith.constant 0 : i32
    return %c0_i32, %c0_i32_0 : i32, i32
  }
  func.func @transform_9(%arg0: i32) -> (i32, i32) {
    %c0_i32 = arith.constant 0 : i32
    %c0_i32_0 = arith.constant 0 : i32
    %c0_i32_1 = arith.constant 0 : i32
    return %c0_i32, %c0_i32_0 : i32, i32
  }
  func.func @transform_10(%arg0: i32) -> (i32, i32) {
    %c0_i32 = arith.constant 0 : i32
    %c0_i32_0 = arith.constant 0 : i32
    return %arg0, %c0_i32 : i32, i32
  }
}

</mosaic_0001>

<bundles_post_ra>
// kernel: model1_forward.1
= control target key start
LH: loop header
LB: loop body
LE: loop exit
PB: predicated region body
PF: predicated region fallthrough
CT: control target
= control target key end

     0   :  { %vm97_vm0 = vcmask 1043456   ;;  %vm84_vm1 = vcmask 195584   ;;  %v3295_v28 = vmov 0   ;;  %vm416_vm2 = vcmask 523264   ;;  %s2237_s14 = smov 64   ;;  %s3284_s2 = inlined_call_operand.vmem [shape: bf16[24,64], index: 2, kind: input, shape index: {}]   ;;  %s3285_s0 = inlined_call_operand.vmem [shape: bf16[8,8,24], index: 0, kind: input, shape index: {}]   ;;  %s3286_s1 = inlined_call_operand.vmem [shape: bf16[8,8,24], index: 1, kind: input, shape index: {}]   ;;  %s3287_s4 = inlined_call_operand.vmem [shape: bf16[64,512], index: 4, kind: input, shape index: {}]   ;;  %s3288_s6 = inlined_call_operand.vmem [shape: bf16[128,512], index: 6, kind: input, shape index: {}]   ;;  %s3289_s3 = inlined_call_operand.vmem [shape: f32[1,64], index: 3, kind: input, shape index: {}]   ;;  %s3290_s5 = inlined_call_operand.vmem [shape: f32[1,512], index: 5, kind: input, shape index: {}]   ;;  %s3291_s7 = inlined_call_operand.vmem [shape: f32[1,128], index: 7, kind: input, shape index: {}]   ;;  %s3292_s8 = inlined_call_operand.vmem [shape: bf16[128,128], index: 8, kind: input, shape index: {}]   ;;  %s3293_s9 = inlined_call_operand.vmem [shape: f32[1,128], index: 9, kind: input, shape index: {}]   ;;  %s3294_s10 = inlined_call_operand.vmem [shape: f32[8,128], index: 10, kind: output, shape index: {}]  }
   0x1   :  { %v1985_v0 = vld [vmem:[%s3284_s2] sm:$0xff]   ;;  %v1986_v1 = vld [vmem:[%s3284_s2 + $0x8] ss:$0 sps:$4 sm:$0xff]   ;;  %v1989_v5 = vld [vmem:[%s3285_s0 + $0x10] sm:$0xff]   ;;  %461 = vmatprep.mubr.bf16.mxu0 %v3295_v28  ;;  %vm2239_vm4 = vmmov 0  }
   0x2   :  { %1935 = vmatprep.subr.bf16.mxu1 %v1985_v0  ;;  %v1987_v2 = vld [vmem:[%s3285_s0] sm:$0xff]   ;;  %v99_v3 = vsel %vm97_vm0, %v1986_v1, 0  ;;  %v1988_v4 = vld [vmem:[%s3285_s0 + $0x8] sm:$0xff]   ;;  %v1990_v6 = vld [vmem:[%s3285_s0 + $0x18] sm:$0xff]  }
   0x3   :  { %1936 = vmatpush3.bf16.msra.mxu1 %v1985_v0  ;;  %1939 = vmatprep.mubr.msk.bf16.mxu1 %vm84_vm1, %v1987_v2  ;;  %v1991_v7 = vld [vmem:[%s3286_s1] sm:$0xff]   ;;  %v1992_v8 = vld [vmem:[%s3286_s1 + $0x8] sm:$0xff]   ;;  %v1993_v9 = vld [vmem:[%s3286_s1 + $0x10] sm:$0xff]  }
   0x4   :  { %1979 = vmatprep.subr.msk.bf16.mxu1 %vm97_vm0, %v1986_v1  ;;  %v1994_v10 = vld [vmem:[%s3286_s1 + $0x18] sm:$0xff]   ;;  %v1995_v11 = vld [vmem:[%s3287_s4 + $0x4] ss:$16 sps:$4 sm:$0xff]   ;;  %v2000_v14 = vld [vmem:[%s3287_s4] ss:$16 sps:$4 sm:$0xff]  }
   0x5   :  { %v1997_v12 = vld [vmem:[%s3287_s4 + $0x8] ss:$16 sps:$4 sm:$0xff]   ;;  %429 = vmatprep.subr.bf16.mxu0 %v1995_v11  ;;  %v1999_v13 = vld [vmem:[%s3287_s4 + $0xc] ss:$16 sps:$4 sm:$0xff]   ;;  %v2001_v15 = vld [vmem:[%s3287_s4 + $0x24] ss:$16 sps:$4 sm:$0xff]  }
   0x6   :  { %430 = vmatpush1.bf16.msra.mxu0 %v2000_v14  ;;  %v2005_v16 = vld [vmem:[%s3287_s4 + $0x2c] ss:$16 sps:$4 sm:$0xff]   ;;  %v2003_v17 = vld [vmem:[%s3287_s4 + $0x28] ss:$16 sps:$4 sm:$0xff]   ;;  %v2006_v18 = vld [vmem:[%s3287_s4 + $0x20] ss:$16 sps:$4 sm:$0xff]  }
   0x7   :  { %1938 = vmatpush3.bf16.msra.mxu1 %v99_v3  ;;  %431 = vmatprep.subr.bf16.mxu0 %v2001_v15  ;;  %v2007_v19 = vld [vmem:[%s3287_s4 + $0x44] ss:$16 sps:$4 sm:$0xff]   ;;  %v2011_v20 = vld [vmem:[%s3287_s4 + $0x4c] ss:$16 sps:$4 sm:$0xff]   ;;  %v2009_v21 = vld [vmem:[%s3287_s4 + $0x48] ss:$16 sps:$4 sm:$0xff]  }
   0x8   :  { %1947 = vmatprep.subr.bf16.mxu1 %v1985_v0  ;;  %v2012_v22 = vld [vmem:[%s3287_s4 + $0x40] ss:$16 sps:$4 sm:$0xff]   ;;  %v2013_v23 = vld [vmem:[%s3287_s4 + $0x64] ss:$16 sps:$4 sm:$0xff]   ;;  %v2017_v24 = vld [vmem:[%s3287_s4 + $0x6c] ss:$16 sps:$4 sm:$0xff]  }
   0x9   :  { %v2015_v25 = vld [vmem:[%s3287_s4 + $0x68] ss:$16 sps:$4 sm:$0xff]   ;;  %v2018_v26 = vld [vmem:[%s3287_s4 + $0x60] ss:$16 sps:$4 sm:$0xff]   ;;  %v2387_v27 = vld [vmem:[%s3288_s6 + $0x4] ss:$16 sps:$4 sm:$0xff]  }
   0xa   :  { %1940 = vmatmul.mubr.msk.bf16.vlgmr.msra.gmra.mrb[0].mxu1 %vm84_vm1, %v1988_v4  ;;  %432 = vmatpush1.bf16.msra.mxu0 %v2006_v18  ;;  %v2393_v29 = vld [vmem:[%s3288_s6 + $0xc] ss:$16 sps:$4 sm:$0xff]   ;;  %v1847_v39 = vld [vmem:[%s3289_s3] ss:$0 sm:$0xff]  ;;  %v2409_v60 = vld [vmem:[%s3288_s6 + $0x8] ss:$16 sps:$4 sm:$0xff]  }
   0xb   :  { %1948 = vmatpush3.bf16.msra.mxu1 %v1985_v0  ;;  %1943 = vmatprep.mubr.msk.bf16.mxu1 %vm84_vm1, %v1989_v5  ;;  %v2404_v59 = vld [vmem:[%s3288_s6] ss:$16 sps:$4 sm:$0xff]   ;;  %v2414_v0 = vld [vmem:[%s3288_s6 + $0x24] ss:$16 sps:$4 sm:$0xff]  }
   0xc   :  { %1980 = vmatprep.subr.msk.bf16.mxu1 %vm97_vm0, %v1986_v1  ;;  %433 = vmatprep.subr.bf16.mxu0 %v2007_v19  ;;  %v2419_v1 = vld [vmem:[%s3288_s6 + $0x2c] ss:$16 sps:$4 sm:$0xff]   ;;  %v2440_v11 = vld [vmem:[%s3288_s6 + $0x44] ss:$16 sps:$4 sm:$0xff]   ;;  %v2454_v18 = vld [vmem:[%s3288_s6 + $0x40] ss:$16 sps:$4 sm:$0xff]  }
   0xd   :  { %v2459_v19 = vld [vmem:[%s3288_s6 + $0x48] ss:$16 sps:$4 sm:$0xff]  }
   0xe   :  { %434 = vmatpush1.bf16.msra.mxu0 %v2012_v22  ;;  %v2471_v22 = vld [vmem:[%s3288_s6 + $0x6c] ss:$16 sps:$4 sm:$0xff]  }
   0xf   :  { %1950 = vmatpush3.bf16.msra.mxu1 %v99_v3  ;;  %435 = vmatprep.subr.bf16.mxu0 %v2013_v23  ;;  %v2480_v23 = vld [vmem:[%s3288_s6 + $0x60] ss:$16 sps:$4 sm:$0xff]  }
  0x10   :  { %502 = vmatprep.subr.bf16.mxu1 %v1999_v13 }
  0x12   :  { %1944 = vmatmul.mubr.msk.bf16.gmra.mrb[4].mxu1 %vm84_vm1, %v1990_v6  ;;  %436 = vmatpush1.bf16.msra.mxu0 %v2018_v26  ;;  %v2497_v26 = vld [vmem:[%s3288_s6 + $0x8c] ss:$16 sps:$4 sm:$0xff]  }
  0x13   :  { %1951 = vmatprep.mubr.msk.bf16.mxu1 %vm84_vm1, %v1991_v7  ;;  %793 = vmatprep.subr.bf16.mxu0 %v2387_v27 }
  0x1a   :  { %1952 = vmatmul.mubr.msk.bf16.vlgmr.msra.gmra.mrb[8].mxu1 %vm84_vm1, %v1992_v8  ;;  %v2428_v8 = vld [vmem:[%s3288_s6 + $0x20] ss:$16 sps:$4 sm:$0xff]  }
  0x1b   :  { %1955 = vmatprep.mubr.msk.bf16.mxu1 %vm84_vm1, %v1993_v9  ;;  %503 = vmatpush1.bf16.msra.mxu1 %v1997_v12  ;;  %v2433_v9 = vld [vmem:[%s3288_s6 + $0x28] ss:$16 sps:$4 sm:$0xff]   ;;  %v2445_v12 = vld [vmem:[%s3288_s6 + $0x4c] ss:$16 sps:$4 sm:$0xff]  }
  0x1c   :  { %504 = vmatprep.subr.bf16.mxu1 %v2005_v16 }
  0x1f   :  { %505 = vmatpush1.bf16.msra.mxu1 %v2003_v17 }
  0x20   :  { %506 = vmatprep.subr.bf16.mxu1 %v2011_v20 }
  0x22   :  { %1956 = vmatmul.mubr.msk.bf16.gmra.mrb[12].mxu1 %vm84_vm1, %v1994_v10 }
  0x23   :  { %507 = vmatpush1.bf16.msra.mxu1 %v2009_v21  ;;  %534 = vmatprep.mubr.bf16.mxu1 %v3295_v28  ;;  %v2466_v21 = vld [vmem:[%s3288_s6 + $0x64] ss:$16 sps:$4 sm:$0xff]  }
  0x24   :  { %508 = vmatprep.subr.bf16.mxu1 %v2017_v24  ;;  %v2485_v24 = vld [vmem:[%s3288_s6 + $0x68] ss:$16 sps:$4 sm:$0xff]  }
  0x27   :  { %509 = vmatpush1.bf16.msra.mxu1 %v2015_v25  ;;  %v2492_v25 = vld [vmem:[%s3288_s6 + $0x84] ss:$16 sps:$4 sm:$0xff]  }
  0x28   :  { %834 = vmatprep.subr.bf16.mxu1 %v2393_v29 }
  0xdd   :  { %v1941_v30 = vpop.f32.mrb[0].mxu1 }
  0xde   :  { %v135_v31 = vpop.f32.mrb[1].mxu1 }
  0xdf   :  { %v1942_v32 = vpop.f32.mrb[2].mxu1 }
  0xe0   :  { %v138_v33 = vpop.f32.mrb[3].mxu1 }
  0xe5   :  { %v1945_v34 = vpop.f32.mrb[4].mxu1 }
  0xe6   :  { %v151_v35 = vpop.f32.mrb[5].mxu1 }
  0xe7   :  { %v1946_v36 = vpop.f32.mrb[6].mxu1 }
  0xe8   :  { %v154_v37 = vpop.f32.mrb[7].mxu1 }
  0xed   :  { %v1953_v38 = vpop.f32.mrb[8].mxu1 }
  0xee   :  { %v265_v40 = vmax.f32 %v1941_v30, %v1953_v38  ;;  %v232_v41 = vpop.f32.mrb[9].mxu1  ;;  %v2506_v30 = vld [vmem:[%s3288_s6 + $0x80] ss:$16 sps:$4 sm:$0xff]  }
  0xef   :  { %v263_v42 = vmax.f32 %v135_v31, %v232_v41  ;;  %v1954_v43 = vpop.f32.mrb[10].mxu1  ;;  %v2511_v31 = vld [vmem:[%s3288_s6 + $0x88] ss:$16 sps:$4 sm:$0xff]   ;;  %v2558_v38 = vld [vmem:[%s3288_s6 + $0xc0] ss:$16 sps:$4 sm:$0xff]  }
  0xf0   :  { %v280_v44 = vadd.f32 %v1847_v39, %v265_v40  ;;  %v266_v45 = vmax.f32 %v1942_v32, %v1954_v43  ;;  %v235_v46 = vpop.f32.mrb[11].mxu1  ;;  %v2518_v32 = vld [vmem:[%s3288_s6 + $0xa4] ss:$16 sps:$4 sm:$0xff]   ;;  %v2575_v41 = vld [vmem:[%s3288_s6 + $0xec] ss:$16 sps:$4 sm:$0xff]  }
  0xf1   :  { %v278_v47 = vadd.f32 %v1847_v39, %v263_v42  ;;  %v264_v48 = vmax.f32 %v138_v33, %v235_v46  ;;  %v2523_v33 = vld [vmem:[%s3288_s6 + $0xac] ss:$16 sps:$4 sm:$0xff]   ;;  %v2570_v40 = vld [vmem:[%s3288_s6 + $0xe4] ss:$16 sps:$4 sm:$0xff]   ;;  %v2584_v42 = vld [vmem:[%s3288_s6 + $0xe0] ss:$16 sps:$4 sm:$0xff]  }
  0xf2   :  { %v281_v49 = vadd.f32 %v1847_v39, %v266_v45  ;;  %v288_v51 = vmax.f32 %v280_v44, 0.0  ;;  %v2589_v43 = vld [vmem:[%s3288_s6 + $0xe8] ss:$16 sps:$4 sm:$0xff]   ;;  %v3297_v44 = vlaneseq }
  0xf3   :  { %v279_v50 = vadd.f32 %v1847_v39, %v264_v48  ;;  %v286_v53 = vmax.f32 %v278_v47, 0.0  ;;  %v314_v48 = vld [vmem:[%s3290_s5] sm:$0xf] }
  0xf4   :  { %v289_v52 = vmax.f32 %v281_v49, 0.0  ;;  %v317_v45 = vshrl.u32 %v3297_v44, 7 }
  0xf5   :  { %v287_v54 = vmax.f32 %v279_v50, 0.0  ;;  %v1957_v55 = vpop.f32.mrb[12].mxu1 }
  0xf6   :  { %v295_v56 = vpack.c.bf16 %v289_v52, %v288_v51  ;;  %v269_v57 = vmax.f32 %v1945_v34, %v1957_v55  ;;  %v248_v58 = vpop.f32.mrb[13].mxu1  ;;  %v2532_v34 = vld [vmem:[%s3288_s6 + $0xa0] ss:$16 sps:$4 sm:$0xff]   ;;  %v318_v46 = vsub.s32 0, %v317_v45  ;;  %v326_v47 = vsub.s32 2, %v317_v45 }
  0xf7   :  { %v294_v61 = vpack.c.bf16 %v287_v54, %v286_v53  ;;  %v267_v62 = vmax.f32 %v151_v35, %v248_v58  ;;  %v1958_v63 = vpop.f32.mrb[14].mxu1  ;;  %v2537_v35 = vld [vmem:[%s3288_s6 + $0xa8] ss:$16 sps:$4 sm:$0xff]   ;;  %v322_v49 = vsub.s32 1, %v317_v45  ;;  %v330_v50 = vsub.s32 3, %v317_v45 }
  0xf8   :  { %v284_v2 = vadd.f32 %v1847_v39, %v269_v57  ;;  %v270_v3 = vmax.f32 %v1946_v36, %v1958_v63  ;;  %v251_v4 = vpop.f32.mrb[15].mxu1  ;;  %v2544_v36 = vld [vmem:[%s3288_s6 + $0xc4] ss:$16 sps:$4 sm:$0xff]   ;;  %v319_v53 = vrot.slane %v314_v48, %v318_v46  ;;  %v327_v54 = vrot.slane %v314_v48, %v326_v47 }
  0xf9   :  { %v282_v5 = vadd.f32 %v1847_v39, %v267_v62  ;;  %v268_v6 = vmax.f32 %v154_v37, %v251_v4  ;;  %1864 = vmatmul.mubr.msk.bf16.vlgmr.msra.gmra.mrb[0].mxu0 %vm416_vm2, %v294_v61  ;;  %1868 = vmatmul.mubr.msk.bf16.vlgmr.msra.gmra.mrb[16].mxu1 %vm416_vm2, %v294_v61  ;;  %v2549_v37 = vld [vmem:[%s3288_s6 + $0xcc] ss:$16 sps:$4 sm:$0xff]   ;;  %v323_v57 = vrot.slane %v314_v48, %v322_v49 }
  0xfa   :  { %v285_v7 = vadd.f32 %v1847_v39, %v270_v3  ;;  %794 = vmatpush1.bf16.msra.mxu0 %v2404_v59  ;;  %835 = vmatpush1.bf16.msra.mxu1 %v2409_v60  ;;  %v292_v13 = vmax.f32 %v284_v2, 0.0  ;;  %v2645_v58 = vrot.slane %v314_v48, %v330_v50 }
  0xfb   :  { %v283_v10 = vadd.f32 %v1847_v39, %v268_v6  ;;  %795 = vmatprep.subr.bf16.mxu0 %v2414_v0  ;;  %836 = vmatprep.subr.bf16.mxu1 %v2419_v1  ;;  %v290_v15 = vmax.f32 %v282_v5, 0.0  ;;  %v2563_v39 = vld [vmem:[%s3288_s6 + $0xc8] ss:$16 sps:$4 sm:$0xff]  }
  0xfc   :  { %v293_v14 = vmax.f32 %v285_v7, 0.0  ;;  %471 = vmatprep.mubr.bf16.mxu0 %v3295_v28  ;;  %544 = vmatprep.mubr.bf16.mxu1 %v3295_v28 }
  0xfd   :  { %v291_v16 = vmax.f32 %v283_v10, 0.0 }
  0xfe   :  { %v297_v17 = vpack.c.bf16 %v293_v14, %v292_v13  ;;  %796 = vmatpush1.bf16.msra.mxu0 %v2428_v8  ;;  %837 = vmatpush1.bf16.msra.mxu1 %v2433_v9 }
  0xff   :  { %v296_v20 = vpack.c.bf16 %v291_v16, %v290_v15  ;;  %797 = vmatprep.subr.bf16.mxu0 %v2440_v11  ;;  %838 = vmatprep.subr.bf16.mxu1 %v2445_v12 }
 0x101   :  { %1865 = vmatmul.mubr.msk.bf16.gmra.mrb[4].mxu0 %vm416_vm2, %v295_v56  ;;  %1869 = vmatmul.mubr.msk.bf16.gmra.mrb[20].mxu1 %vm416_vm2, %v295_v56 }
 0x102   :  { %798 = vmatpush1.bf16.msra.mxu0 %v2454_v18  ;;  %839 = vmatpush1.bf16.msra.mxu1 %v2459_v19 }
 0x103   :  { %799 = vmatprep.subr.bf16.mxu0 %v2466_v21  ;;  %840 = vmatprep.subr.bf16.mxu1 %v2471_v22 }
 0x104   :  { %481 = vmatprep.mubr.bf16.mxu0 %v3295_v28  ;;  %554 = vmatprep.mubr.bf16.mxu1 %v3295_v28 }
 0x106   :  { %800 = vmatpush1.bf16.msra.mxu0 %v2480_v23  ;;  %841 = vmatpush1.bf16.msra.mxu1 %v2485_v24 }
 0x107   :  { %801 = vmatprep.subr.bf16.mxu0 %v2492_v25  ;;  %842 = vmatprep.subr.bf16.mxu1 %v2497_v26 }
 0x109   :  { %1866 = vmatmul.mubr.msk.bf16.gmra.mrb[8].mxu0 %vm416_vm2, %v296_v20  ;;  %1870 = vmatmul.mubr.msk.bf16.gmra.mrb[24].mxu1 %vm416_vm2, %v296_v20 }
 0x10a   :  { %802 = vmatpush1.bf16.msra.mxu0 %v2506_v30  ;;  %843 = vmatpush1.bf16.msra.mxu1 %v2511_v31 }
 0x10b   :  { %803 = vmatprep.subr.bf16.mxu0 %v2518_v32  ;;  %844 = vmatprep.subr.bf16.mxu1 %v2523_v33 }
 0x10c   :  { %491 = vmatprep.mubr.bf16.mxu0 %v3295_v28  ;;  %564 = vmatprep.mubr.bf16.mxu1 %v3295_v28 }
 0x10e   :  { %804 = vmatpush1.bf16.msra.mxu0 %v2532_v34  ;;  %845 = vmatpush1.bf16.msra.mxu1 %v2537_v35 }
 0x10f   :  { %805 = vmatprep.subr.bf16.mxu0 %v2544_v36  ;;  %846 = vmatprep.subr.bf16.mxu1 %v2549_v37 }
 0x111   :  { %1867 = vmatmul.mubr.msk.bf16.gmra.mrb[12].mxu0 %vm416_vm2, %v297_v17  ;;  %1871 = vmatmul.mubr.msk.bf16.gmra.mrb[28].mxu1 %vm416_vm2, %v297_v17 }
 0x112   :  { %806 = vmatpush1.bf16.msra.mxu0 %v2558_v38  ;;  %847 = vmatpush1.bf16.msra.mxu1 %v2563_v39 }
 0x113   :  { %807 = vmatprep.subr.bf16.mxu0 %v2570_v40  ;;  %848 = vmatprep.subr.bf16.mxu1 %v2575_v41 }
 0x114   :  { %825 = vmatprep.mubr.bf16.mxu0 %v3295_v28  ;;  %866 = vmatprep.mubr.bf16.mxu1 %v3295_v28 }
 0x116   :  { %808 = vmatpush1.bf16.msra.mxu0 %v2584_v42  ;;  %849 = vmatpush1.bf16.msra.mxu1 %v2589_v43 }
 0x117   :  { %910 = vmatprep.subr.bf16.mxu0 %v2387_v27  ;;  %951 = vmatprep.subr.bf16.mxu1 %v2393_v29 }
 0x119   :  { %826 = vmatmul.mubr.bf16.vlgmr.msra.gmra.mrb[16].mxu0 %v3295_v28  ;;  %867 = vmatmul.mubr.bf16.vlgmr.msra.gmra.mrb[32].mxu1 %v3295_v28 }
 0x11a   :  { %911 = vmatpush1.bf16.msra.mxu0 %v2404_v59  ;;  %952 = vmatpush1.bf16.msra.mxu1 %v2409_v60 }
 0x11b   :  { %912 = vmatprep.subr.bf16.mxu0 %v2414_v0  ;;  %953 = vmatprep.subr.bf16.mxu1 %v2419_v1 }
 0x11c   :  { %942 = vmatprep.mubr.bf16.mxu0 %v3295_v28  ;;  %983 = vmatprep.mubr.bf16.mxu1 %v3295_v28 }
 0x11e   :  { %913 = vmatpush1.bf16.msra.mxu0 %v2428_v8  ;;  %954 = vmatpush1.bf16.msra.mxu1 %v2433_v9 }
 0x11f   :  { %914 = vmatprep.subr.bf16.mxu0 %v2440_v11  ;;  %955 = vmatprep.subr.bf16.mxu1 %v2445_v12 }
 0x122   :  { %915 = vmatpush1.bf16.msra.mxu0 %v2454_v18  ;;  %956 = vmatpush1.bf16.msra.mxu1 %v2459_v19 }
 0x123   :  { %916 = vmatprep.subr.bf16.mxu0 %v2466_v21  ;;  %957 = vmatprep.subr.bf16.mxu1 %v2471_v22 }
 0x126   :  { %917 = vmatpush1.bf16.msra.mxu0 %v2480_v23  ;;  %958 = vmatpush1.bf16.msra.mxu1 %v2485_v24 }
 0x127   :  { %918 = vmatprep.subr.bf16.mxu0 %v2492_v25  ;;  %959 = vmatprep.subr.bf16.mxu1 %v2497_v26 }
 0x12a   :  { %919 = vmatpush1.bf16.msra.mxu0 %v2506_v30  ;;  %960 = vmatpush1.bf16.msra.mxu1 %v2511_v31 }
 0x12b   :  { %920 = vmatprep.subr.bf16.mxu0 %v2518_v32  ;;  %961 = vmatprep.subr.bf16.mxu1 %v2523_v33 }
 0x12e   :  { %921 = vmatpush1.bf16.msra.mxu0 %v2532_v34  ;;  %962 = vmatpush1.bf16.msra.mxu1 %v2537_v35 }
 0x12f   :  { %922 = vmatprep.subr.bf16.mxu0 %v2544_v36  ;;  %963 = vmatprep.subr.bf16.mxu1 %v2549_v37 }
 0x132   :  { %923 = vmatpush1.bf16.msra.mxu0 %v2558_v38  ;;  %964 = vmatpush1.bf16.msra.mxu1 %v2563_v39 }
 0x133   :  { %924 = vmatprep.subr.bf16.mxu0 %v2570_v40  ;;  %965 = vmatprep.subr.bf16.mxu1 %v2575_v41 }
 0x136   :  { %925 = vmatpush1.bf16.msra.mxu0 %v2584_v42  ;;  %966 = vmatpush1.bf16.msra.mxu1 %v2589_v43 }
 0x137   :  { %1027 = vmatprep.subr.bf16.mxu0 %v2387_v27  ;;  %1068 = vmatprep.subr.bf16.mxu1 %v2393_v29 }
 0x1cc   :  { %v2639_v51 = vpop.f32.mrb[0].mxu0  ;;  %v2641_v52 = vpop.f32.mrb[16].mxu1 }
 0x1cd   :  { %v465_v55 = vpop.f32.mrb[1].mxu0  ;;  %v2643_v56 = vpop.f32.mrb[17].mxu1 }
 0x1ce   :  { %v467_v61 = vpop.f32.mrb[2].mxu0  ;;  %v540_v62 = vpop.f32.mrb[18].mxu1 }
 0x1cf   :  { %v2647_v63 = vadd.f32 %v467_v61, %v319_v53  ;;  %v2649_v2 = vadd.f32 %v540_v62, %v327_v54  ;;  %v469_v3 = vpop.f32.mrb[3].mxu0  ;;  %v542_v4 = vpop.f32.mrb[19].mxu1 }
 0x1d0   :  { %v2651_v5 = vadd.f32 %v469_v3, %v323_v57  ;;  %v2654_v6 = vadd.f32 %v542_v4, %v2645_v58 }
 0x1d4   :  { %v473_v7 = vpop.f32.mrb[4].mxu0  ;;  %v546_v10 = vpop.f32.mrb[20].mxu1 }
 0x1d5   :  { %v2656_v13 = vadd.f32 %v473_v7, %v319_v53  ;;  %v2658_v14 = vadd.f32 %v546_v10, %v327_v54  ;;  %v475_v15 = vpop.f32.mrb[5].mxu0  ;;  %v548_v16 = vpop.f32.mrb[21].mxu1 }
 0x1d6   :  { %v2660_v17 = vadd.f32 %v475_v15, %v323_v57  ;;  %v2663_v20 = vadd.f32 %v548_v16, %v2645_v58  ;;  %v477_v45 = vpop.f32.mrb[6].mxu0  ;;  %v550_v46 = vpop.f32.mrb[22].mxu1 }
 0x1d7   :  { %v2665_v47 = vadd.f32 %v477_v45, %v319_v53  ;;  %v2667_v48 = vadd.f32 %v550_v46, %v327_v54  ;;  %v479_v49 = vpop.f32.mrb[7].mxu0  ;;  %v552_v50 = vpop.f32.mrb[23].mxu1 }
 0x1d8   :  { %3298 = vst [vmem:[#allocation2_spill] sm:$0xff] %v2660_v17  ;;  %3299 = vst [vmem:[#allocation3_spill] sm:$0xff] %v2663_v20  ;;  %v2669_v61 = vadd.f32 %v479_v49, %v323_v57  ;;  %v2672_v62 = vadd.f32 %v552_v50, %v2645_v58 }
 0x1d9   :  { %3300 = vst [vmem:[#allocation4_spill] sm:$0xff] %v2665_v47  ;;  %3301 = vst [vmem:[#allocation5_spill] sm:$0xff] %v2667_v48 }
 0x1da   :  { %3302 = vst [vmem:[#allocation6_spill] sm:$0xff] %v2669_v61  ;;  %3303 = vst [vmem:[#allocation7_spill] sm:$0xff] %v2672_v62 }
 0x1dc   :  { %v483_v3 = vpop.f32.mrb[8].mxu0  ;;  %v556_v4 = vpop.f32.mrb[24].mxu1 }
 0x1dd   :  { %v2674_v7 = vadd.f32 %v483_v3, %v319_v53  ;;  %v2676_v10 = vadd.f32 %v556_v4, %v327_v54  ;;  %v485_v15 = vpop.f32.mrb[9].mxu0  ;;  %v558_v16 = vpop.f32.mrb[25].mxu1 }
 0x1de   :  { %v2678_v28 = vadd.f32 %v485_v15, %v323_v57  ;;  %v2681_v45 = vadd.f32 %v558_v16, %v2645_v58  ;;  %v487_v46 = vpop.f32.mrb[10].mxu0  ;;  %v560_v44 = vpop.f32.mrb[26].mxu1 }
 0x1df   :  { %3304 = vst [vmem:[#allocation8_spill] sm:$0xff] %v2674_v7  ;;  %3305 = vst [vmem:[#allocation9_spill] sm:$0xff] %v2676_v10  ;;  %v2683_v49 = vadd.f32 %v487_v46, %v319_v53  ;;  %v2685_v61 = vadd.f32 %v560_v44, %v327_v54  ;;  %v489_v50 = vpop.f32.mrb[11].mxu0  ;;  %v562_v62 = vpop.f32.mrb[27].mxu1 }
 0x1e0   :  { %3306 = vst [vmem:[#allocation10_spill] sm:$0xff] %v2678_v28  ;;  %3307 = vst [vmem:[#allocation11_spill] sm:$0xff] %v2681_v45  ;;  %v2687_v48 = vadd.f32 %v489_v50, %v323_v57  ;;  %v2690_v3 = vadd.f32 %v562_v62, %v2645_v58 }
 0x1e1   :  { %3308 = vst [vmem:[#allocation12_spill] sm:$0xff] %v2683_v49  ;;  %3309 = vst [vmem:[#allocation13_spill] sm:$0xff] %v2685_v61 }
 0x1e2   :  { %3310 = vst [vmem:[#allocation14_spill] sm:$0xff] %v2687_v48  ;;  %3311 = vst [vmem:[#allocation15_spill] sm:$0xff] %v2690_v3 }
 0x1e4   :  { %v493_v4 = vpop.f32.mrb[12].mxu0  ;;  %v566_v10 = vpop.f32.mrb[28].mxu1 }
 0x1e5   :  { %v2692_v15 = vadd.f32 %v493_v4, %v319_v53  ;;  %v2694_v28 = vadd.f32 %v566_v10, %v327_v54  ;;  %v495_v16 = vpop.f32.mrb[13].mxu0  ;;  %v568_v45 = vpop.f32.mrb[29].mxu1  ;;  %v464_v4 = vadd.f32 %v2639_v51, %v319_v53 }
 0x1e6   :  { %v2696_v7 = vadd.f32 %v495_v16, %v323_v57  ;;  %v2699_v44 = vadd.f32 %v568_v45, %v2645_v58  ;;  %v497_v46 = vpop.f32.mrb[14].mxu0  ;;  %v570_v61 = vpop.f32.mrb[30].mxu1  ;;  %v537_v16 = vadd.f32 %v2641_v52, %v327_v54 }
 0x1e7   :  { %3312 = vst [vmem:[#allocation16_spill] sm:$0xff] %v2692_v15  ;;  %3313 = vst [vmem:[#allocation17_spill] sm:$0xff] %v2694_v28  ;;  %v2701_v50 = vadd.f32 %v497_v46, %v319_v53  ;;  %v2703_v48 = vadd.f32 %v570_v61, %v327_v54  ;;  %v499_v62 = vpop.f32.mrb[15].mxu0  ;;  %v572_v3 = vpop.f32.mrb[31].mxu1 }
 0x1e8   :  { %3314 = vst [vmem:[#allocation18_spill] sm:$0xff] %v2696_v7  ;;  %3315 = vst [vmem:[#allocation19_spill] sm:$0xff] %v2699_v44  ;;  %v2705_v49 = vadd.f32 %v499_v62, %v323_v57  ;;  %v2708_v10 = vadd.f32 %v572_v3, %v2645_v58  ;;  %v466_v7 = vadd.f32 %v465_v55, %v323_v57  ;;  %v3320_v55 = vlaneseq }
 0x1e9   :  { %3316 = vst [vmem:[#allocation20_spill] sm:$0xff] %v2701_v50  ;;  %3317 = vst [vmem:[#allocation21_spill] sm:$0xff] %v2703_v48 }
 0x1ea   :  { %3318 = vst [vmem:[#allocation22_spill] sm:$0xff] %v2705_v49  ;;  %3319 = vst [vmem:[#allocation23_spill] sm:$0xff] %v2708_v10  ;;  %v2713_v57 = vand.u32 127, %v3320_v55 }
 0x1ec   :  { %v827_v45 = vpop.f32.mrb[16].mxu0  ;;  %v868_v44 = vpop.f32.mrb[32].mxu1  ;;  %vm632_vm3 = vcmp.lt.s32.totalorder %v2713_v57, 64 }
 0x1ed   :  { %v875_v28 = vadd.f32 %v827_v45, %v464_v4  ;;  %v877_v15 = vadd.f32 %v868_v44, %v537_v16  ;;  %v829_v46 = vpop.f32.mrb[17].mxu0  ;;  %v870_v50 = vpop.f32.mrb[33].mxu1 }
 0x1ee   :  { %v876_v61 = vadd.f32 %v829_v46, %v466_v7  ;;  %v872_v48 = vpop.f32.mrb[34].mxu1  ;;  %v831_v47 = vpop.f32.mrb[18].mxu0 }
 0x1ef   :  { %v880_v20 = vsub.f32 0.0, %v877_v15  ;;  %v873_v62 = vpop.f32.mrb[35].mxu1  ;;  %v832_v49 = vpop.f32.mrb[19].mxu0  ;;  %v878_v3 = vsub.f32 0.0, %v875_v28  ;;  %v2718_v47 = vld [vmem:[%s3291_s7] ss:$0 sm:$0xff] }
 0x1f0   :  { %v879_v10 = vsub.f32 0.0, %v876_v61  ;;  %v539_v49 = vadd.f32 %v2643_v56, %v2645_v58 }
 0x1f1   :  { %v885_v17 = vmul.f32 1.442695, %v880_v20  ;;  %v881_v51 = vmul.f32 1.442695, %v878_v3  ;;  %v894_v20 = vadd.f32 %v2718_v47, %v870_v50 }
 0x1f2   :  { %v883_v52 = vmul.f32 1.442695, %v879_v10 }
 0x1f3   :  { %2075 = vpow2.f32 %v885_v17 }
 0x1f4   :  { %2077 = vpow2.f32 %v881_v51 }
 0x1fd   :  { %v2076_v53 = vpop.eup %2075 }
 0x1fe   :  { %v889_v54 = vadd.f32 1.0, %v2076_v53  ;;  %v2078_v17 = vpop.eup %2077 }
 0x1ff   :  { %v887_v44 = vadd.f32 1.0, %v2078_v17  ;;  %v3321_v17 = vmov 0  }
 0x200   :  { %2079 = vrcp.f32 %v889_v54 }
 0x201   :  { %2081 = vpow2.f32 %v883_v52 }
 0x20a   :  { %v2080_v28 = vpop.eup %2079 }
 0x20b   :  { %v2082_v48 = vpop.eup %2081  ;;  %v893_v7 = vsel %vm632_vm3, 1.0, %v2080_v28 }
 0x20c   :  { %v895_v15 = vmul.f32 %v894_v20, %v893_v7  ;;  %v888_v10 = vadd.f32 1.0, %v2082_v48 }
 0x20e   :  { %v896_v4 = vadd.f32 %v895_v15, %v539_v49 }
 0x210   :  { %2083 = vtanh.f32 %v896_v4 }
 0x211   :  { %2085 = vrcp.f32 %v887_v44 }
 0x212   :  { %2087 = vrcp.f32 %v888_v10 }
 0x21a   :  { %v2084_v16 = vpop.eup %2083 }
 0x21b   :  { %v2086_v45 = vpop.eup %2085  ;;  %v898_v46 = vsel %vm632_vm3, %v2084_v16, 0.0  ;;  %v905_v50 = vsub.f32 0.0, %v2084_v16 }
 0x21c   :  { %v2088_v61 = vpop.eup %2087  ;;  %v899_v62 = vmul.f32 %v2086_v45, %v898_v46 }
 0x21d   :  { %v906_v3 = vmul.f32 %v2088_v61, %v905_v50 }
 0x21e   :  { %900 = vrot.lane.b32.xlu0 %v899_v62, %s2237_s14 }
 0x21f   :  { %v907_v56 = vadd.f32 %v2084_v16, %v906_v3 }
 0x290   :  { %v901_v58 = vpop.permute.xlu0 %900 }
 0x291   :  { %v2729_v51 = vadd.f32 %v901_v58, %v899_v62 }
 0x293   :  { %2089 = vtanh.f32 %v2729_v51 }
 0x29d   :  { %v2090_v53 = vpop.eup %2089 }
 0x29e   :  { %v904_v52 = vmul.f32 %v2090_v53, %v2088_v61 }
 0x2a0   :  { %v2734_v54 = vsel %vm632_vm3, %v904_v52, %v907_v56 }
 0x2a1   :  { %v909_v55 = vpack.c.bf16 %v2734_v54, %v2734_v54 }
 0x2a3   :  { %943 = vmatmul.mubr.bf16.vlgmr.msra.gmra.mrb[20].mxu0 %v909_v55  ;;  %984 = vmatmul.mubr.bf16.vlgmr.msra.gmra.mrb[36].mxu1 %v909_v55 }
 0x2a4   :  { %1028 = vmatpush1.bf16.msra.mxu0 %v2404_v59  ;;  %1069 = vmatpush1.bf16.msra.mxu1 %v2409_v60 }
 0x2a5   :  { %1029 = vmatprep.subr.bf16.mxu0 %v2414_v0  ;;  %1070 = vmatprep.subr.bf16.mxu1 %v2419_v1 }
 0x2a6   :  { %1059 = vmatprep.mubr.bf16.mxu0 %v3321_v17  ;;  %1100 = vmatprep.mubr.bf16.mxu1 %v3321_v17 }
 0x2a8   :  { %1030 = vmatpush1.bf16.msra.mxu0 %v2428_v8  ;;  %1071 = vmatpush1.bf16.msra.mxu1 %v2433_v9 }
 0x2a9   :  { %1031 = vmatprep.subr.bf16.mxu0 %v2440_v11  ;;  %1072 = vmatprep.subr.bf16.mxu1 %v2445_v12 }
 0x2ac   :  { %1032 = vmatpush1.bf16.msra.mxu0 %v2454_v18  ;;  %1073 = vmatpush1.bf16.msra.mxu1 %v2459_v19 }
 0x2ad   :  { %1033 = vmatprep.subr.bf16.mxu0 %v2466_v21  ;;  %1074 = vmatprep.subr.bf16.mxu1 %v2471_v22 }
 0x2b0   :  { %1034 = vmatpush1.bf16.msra.mxu0 %v2480_v23  ;;  %1075 = vmatpush1.bf16.msra.mxu1 %v2485_v24 }
 0x2b1   :  { %1035 = vmatprep.subr.bf16.mxu0 %v2492_v25  ;;  %1076 = vmatprep.subr.bf16.mxu1 %v2497_v26 }
 0x2b4   :  { %1036 = vmatpush1.bf16.msra.mxu0 %v2506_v30  ;;  %1077 = vmatpush1.bf16.msra.mxu1 %v2511_v31 }
 0x2b5   :  { %1037 = vmatprep.subr.bf16.mxu0 %v2518_v32  ;;  %1078 = vmatprep.subr.bf16.mxu1 %v2523_v33 }
 0x2b8   :  { %1038 = vmatpush1.bf16.msra.mxu0 %v2532_v34  ;;  %1079 = vmatpush1.bf16.msra.mxu1 %v2537_v35 }
 0x2b9   :  { %1039 = vmatprep.subr.bf16.mxu0 %v2544_v36  ;;  %1080 = vmatprep.subr.bf16.mxu1 %v2549_v37 }
 0x2bc   :  { %1040 = vmatpush1.bf16.msra.mxu0 %v2558_v38  ;;  %1081 = vmatpush1.bf16.msra.mxu1 %v2563_v39 }
 0x2bd   :  { %1041 = vmatprep.subr.bf16.mxu0 %v2570_v40  ;;  %1082 = vmatprep.subr.bf16.mxu1 %v2575_v41 }
 0x2c0   :  { %1042 = vmatpush1.bf16.msra.mxu0 %v2584_v42  ;;  %1083 = vmatpush1.bf16.msra.mxu1 %v2589_v43 }
 0x2c1   :  { %1144 = vmatprep.subr.bf16.mxu0 %v2387_v27  ;;  %1185 = vmatprep.subr.bf16.mxu1 %v2393_v29 }
 0x376   :  { %v944_v28 = vpop.f32.mrb[20].mxu0  ;;  %v985_v20 = vpop.f32.mrb[36].mxu1 }
 0x377   :  { %v992_v48 = vadd.f32 %v944_v28, %v2647_v63  ;;  %v994_v7 = vadd.f32 %v985_v20, %v2649_v2  ;;  %v946_v49 = vpop.f32.mrb[21].mxu0  ;;  %v987_v15 = vpop.f32.mrb[37].mxu1 }
 0x378   :  { %v993_v44 = vadd.f32 %v946_v49, %v2651_v5  ;;  %v948_v10 = vpop.f32.mrb[22].mxu0  ;;  %v989_v4 = vpop.f32.mrb[38].mxu1  ;;  %v1011_v5 = vadd.f32 %v2718_v47, %v987_v15 }
 0x379   :  { %v997_v16 = vsub.f32 0.0, %v994_v7  ;;  %v949_v45 = vpop.f32.mrb[23].mxu0  ;;  %v990_v46 = vpop.f32.mrb[39].mxu1  ;;  %v995_v61 = vsub.f32 0.0, %v992_v48 }
 0x37a   :  { %v996_v62 = vsub.f32 0.0, %v993_v44 }
 0x37b   :  { %v1002_v50 = vmul.f32 1.442695, %v997_v16  ;;  %v998_v3 = vmul.f32 1.442695, %v995_v61 }
 0x37c   :  { %v1000_v58 = vmul.f32 1.442695, %v996_v62 }
 0x37d   :  { %2091 = vpow2.f32 %v1002_v50 }
 0x37e   :  { %2093 = vpow2.f32 %v998_v3 }
 0x387   :  { %v2092_v56 = vpop.eup %2091 }
 0x388   :  { %v1006_v53 = vadd.f32 1.0, %v2092_v56  ;;  %v2094_v63 = vpop.eup %2093 }
 0x389   :  { %v1004_v20 = vadd.f32 1.0, %v2094_v63 }
 0x38a   :  { %2095 = vrcp.f32 %v1006_v53 }
 0x38b   :  { %2097 = vpow2.f32 %v1000_v58 }
 0x394   :  { %v2096_v2 = vpop.eup %2095 }
 0x395   :  { %v2098_v52 = vpop.eup %2097  ;;  %v1010_v55 = vsel %vm632_vm3, 1.0, %v2096_v2 }
 0x396   :  { %v1012_v28 = vmul.f32 %v1011_v5, %v1010_v55  ;;  %v1005_v7 = vadd.f32 1.0, %v2098_v52  ;;  %v3322_v5 = vld [vmem:[#allocation2_spill] sm:$0xff] }
 0x398   :  { %v1013_v48 = vadd.f32 %v1012_v28, %v2654_v6 }
 0x39a   :  { %2099 = vtanh.f32 %v1013_v48 }
 0x39b   :  { %2101 = vrcp.f32 %v1004_v20 }
 0x39c   :  { %2103 = vrcp.f32 %v1005_v7 }
 0x3a4   :  { %v2100_v49 = vpop.eup %2099 }
 0x3a5   :  { %v2102_v44 = vpop.eup %2101  ;;  %v1015_v10 = vsel %vm632_vm3, %v2100_v49, %v2729_v51  ;;  %v1022_v15 = vsub.f32 %v2734_v54, %v2100_v49 }
 0x3a6   :  { %v2104_v4 = vpop.eup %2103  ;;  %v1016_v16 = vmul.f32 %v2102_v44, %v1015_v10 }
 0x3a7   :  { %v1023_v45 = vmul.f32 %v2104_v4, %v1022_v15 }
 0x3a8   :  { %1017 = vrot.lane.b32.xlu0 %v1016_v16, %s2237_s14 }
 0x3a9   :  { %v1024_v46 = vadd.f32 %v2100_v49, %v1023_v45 }
 0x41a   :  { %v1018_v50 = vpop.permute.xlu0 %1017 }
 0x41b   :  { %v2784_v61 = vadd.f32 %v1018_v50, %v1016_v16 }
 0x41d   :  { %2105 = vtanh.f32 %v2784_v61 }
 0x427   :  { %v2106_v6 = vpop.eup %2105 }
 0x428   :  { %v1021_v62 = vmul.f32 %v2106_v6, %v2104_v4 }
 0x42a   :  { %v2789_v3 = vsel %vm632_vm3, %v1021_v62, %v1024_v46 }
 0x42b   :  { %v1026_v51 = vpack.c.bf16 %v2789_v3, %v2789_v3 }
 0x42d   :  { %1060 = vmatmul.mubr.bf16.vlgmr.msra.gmra.mrb[24].mxu0 %v1026_v51  ;;  %1101 = vmatmul.mubr.bf16.vlgmr.msra.gmra.mrb[40].mxu1 %v1026_v51  ;;  %v3323_v51 = vld [vmem:[#allocation3_spill] sm:$0xff] }
 0x42e   :  { %1145 = vmatpush1.bf16.msra.mxu0 %v2404_v59  ;;  %1186 = vmatpush1.bf16.msra.mxu1 %v2409_v60 }
 0x42f   :  { %1146 = vmatprep.subr.bf16.mxu0 %v2414_v0  ;;  %1187 = vmatprep.subr.bf16.mxu1 %v2419_v1 }
 0x430   :  { %1176 = vmatprep.mubr.bf16.mxu0 %v3321_v17  ;;  %1217 = vmatprep.mubr.bf16.mxu1 %v3321_v17 }
 0x432   :  { %1147 = vmatpush1.bf16.msra.mxu0 %v2428_v8  ;;  %1188 = vmatpush1.bf16.msra.mxu1 %v2433_v9 }
 0x433   :  { %1148 = vmatprep.subr.bf16.mxu0 %v2440_v11  ;;  %1189 = vmatprep.subr.bf16.mxu1 %v2445_v12 }
 0x436   :  { %1149 = vmatpush1.bf16.msra.mxu0 %v2454_v18  ;;  %1190 = vmatpush1.bf16.msra.mxu1 %v2459_v19 }
 0x437   :  { %1150 = vmatprep.subr.bf16.mxu0 %v2466_v21  ;;  %1191 = vmatprep.subr.bf16.mxu1 %v2471_v22 }
 0x43a   :  { %1151 = vmatpush1.bf16.msra.mxu0 %v2480_v23  ;;  %1192 = vmatpush1.bf16.msra.mxu1 %v2485_v24 }
 0x43b   :  { %1152 = vmatprep.subr.bf16.mxu0 %v2492_v25  ;;  %1193 = vmatprep.subr.bf16.mxu1 %v2497_v26 }
 0x43e   :  { %1153 = vmatpush1.bf16.msra.mxu0 %v2506_v30  ;;  %1194 = vmatpush1.bf16.msra.mxu1 %v2511_v31 }
 0x43f   :  { %1154 = vmatprep.subr.bf16.mxu0 %v2518_v32  ;;  %1195 = vmatprep.subr.bf16.mxu1 %v2523_v33 }
 0x442   :  { %1155 = vmatpush1.bf16.msra.mxu0 %v2532_v34  ;;  %1196 = vmatpush1.bf16.msra.mxu1 %v2537_v35 }
 0x443   :  { %1156 = vmatprep.subr.bf16.mxu0 %v2544_v36  ;;  %1197 = vmatprep.subr.bf16.mxu1 %v2549_v37 }
 0x446   :  { %1157 = vmatpush1.bf16.msra.mxu0 %v2558_v38  ;;  %1198 = vmatpush1.bf16.msra.mxu1 %v2563_v39 }
 0x447   :  { %1158 = vmatprep.subr.bf16.mxu0 %v2570_v40  ;;  %1199 = vmatprep.subr.bf16.mxu1 %v2575_v41 }
 0x44a   :  { %1159 = vmatpush1.bf16.msra.mxu0 %v2584_v42  ;;  %1200 = vmatpush1.bf16.msra.mxu1 %v2589_v43 }
 0x44b   :  { %1261 = vmatprep.subr.bf16.mxu0 %v2387_v27  ;;  %1302 = vmatprep.subr.bf16.mxu1 %v2393_v29 }
 0x500   :  { %v1061_v54 = vpop.f32.mrb[24].mxu0  ;;  %v1102_v56 = vpop.f32.mrb[40].mxu1 }
 0x501   :  { %v1109_v58 = vadd.f32 %v1061_v54, %v2656_v13  ;;  %v1111_v53 = vadd.f32 %v1102_v56, %v2658_v14  ;;  %v1063_v63 = vpop.f32.mrb[25].mxu0  ;;  %v1104_v2 = vpop.f32.mrb[41].mxu1 }
 0x502   :  { %v1110_v52 = vadd.f32 %v1063_v63, %v3322_v5  ;;  %v1065_v55 = vpop.f32.mrb[26].mxu0  ;;  %v1106_v28 = vpop.f32.mrb[42].mxu1  ;;  %v1128_v16 = vadd.f32 %v2718_v47, %v1104_v2 }
 0x503   :  { %v1114_v20 = vsub.f32 0.0, %v1111_v53  ;;  %v1066_v7 = vpop.f32.mrb[27].mxu0  ;;  %v1107_v48 = vpop.f32.mrb[43].mxu1  ;;  %v1112_v27 = vsub.f32 0.0, %v1109_v58 }
 0x504   :  { %v1113_v44 = vsub.f32 0.0, %v1110_v52 }
 0x505   :  { %v1119_v49 = vmul.f32 1.442695, %v1114_v20  ;;  %v1115_v29 = vmul.f32 1.442695, %v1112_v27 }
 0x506   :  { %v1117_v15 = vmul.f32 1.442695, %v1113_v44 }
 0x507   :  { %2107 = vpow2.f32 %v1119_v49 }
 0x508   :  { %2109 = vpow2.f32 %v1115_v29 }
 0x511   :  { %v2108_v10 = vpop.eup %2107 }
 0x512   :  { %v1123_v4 = vadd.f32 1.0, %v2108_v10  ;;  %v2110_v13 = vpop.eup %2109  ;;  %v3326_v10 = vld [vmem:[#allocation6_spill] sm:$0xff] }
 0x513   :  { %v1121_v6 = vadd.f32 1.0, %v2110_v13 }
 0x514   :  { %2111 = vrcp.f32 %v1123_v4 }
 0x515   :  { %2113 = vpow2.f32 %v1117_v15 }
 0x51e   :  { %v2112_v14 = vpop.eup %2111 }
 0x51f   :  { %v2114_v45 = vpop.eup %2113  ;;  %v1127_v46 = vsel %vm632_vm3, 1.0, %v2112_v14 }
 0x520   :  { %v1129_v50 = vmul.f32 %v1128_v16, %v1127_v46  ;;  %v1122_v62 = vadd.f32 1.0, %v2114_v45 }
 0x522   :  { %v1130_v54 = vadd.f32 %v1129_v50, %v3323_v51 }
 0x524   :  { %2115 = vtanh.f32 %v1130_v54 }
 0x525   :  { %2117 = vrcp.f32 %v1121_v6 }
 0x526   :  { %2119 = vrcp.f32 %v1122_v62 }
 0x52e   :  { %v2116_v56 = vpop.eup %2115 }
 0x52f   :  { %v2118_v58 = vpop.eup %2117  ;;  %v1132_v53 = vsel %vm632_vm3, %v2116_v56, %v2784_v61  ;;  %v1139_v63 = vsub.f32 %v2789_v3, %v2116_v56  ;;  %v3325_v3 = vld [vmem:[#allocation5_spill] sm:$0xff] }
 0x530   :  { %v2120_v2 = vpop.eup %2119  ;;  %v1133_v5 = vmul.f32 %v2118_v58, %v1132_v53 }
 0x531   :  { %v1140_v52 = vmul.f32 %v2120_v2, %v1139_v63 }
 0x532   :  { %1134 = vrot.lane.b32.xlu1 %v1133_v5, %s2237_s14 }
 0x533   :  { %v1141_v55 = vadd.f32 %v2116_v56, %v1140_v52 }
 0x5a4   :  { %v1135_v28 = vpop.permute.xlu1 %1134 }
 0x5a5   :  { %v2839_v20 = vadd.f32 %v1135_v28, %v1133_v5 }
 0x5a7   :  { %2121 = vtanh.f32 %v2839_v20 }
 0x5b1   :  { %v2122_v7 = vpop.eup %2121 }
 0x5b2   :  { %v1138_v48 = vmul.f32 %v2122_v7, %v2120_v2  ;;  %v3327_v7 = vld [vmem:[#allocation7_spill] sm:$0xff] }
 0x5b4   :  { %v2844_v49 = vsel %vm632_vm3, %v1138_v48, %v1141_v55 }
 0x5b5   :  { %v1143_v61 = vpack.c.bf16 %v2844_v49, %v2844_v49 }
 0x5b7   :  { %1177 = vmatmul.mubr.bf16.vlgmr.msra.gmra.mrb[28].mxu0 %v1143_v61  ;;  %1218 = vmatmul.mubr.bf16.vlgmr.msra.gmra.mrb[44].mxu1 %v1143_v61 }
 0x5b8   :  { %1262 = vmatpush1.bf16.msra.mxu0 %v2404_v59  ;;  %1303 = vmatpush1.bf16.msra.mxu1 %v2409_v60  ;;  %v2883_v59 = vld [vmem:[%s3288_s6 + $0x4] ss:$16 sps:$4 sm:$0xff]   ;;  %v2889_v60 = vld [vmem:[%s3288_s6 + $0xc] ss:$16 sps:$4 sm:$0xff]  }
 0x5b9   :  { %1263 = vmatprep.subr.bf16.mxu0 %v2414_v0  ;;  %1304 = vmatprep.subr.bf16.mxu1 %v2419_v1 }
 0x5ba   :  { %1293 = vmatprep.mubr.bf16.mxu0 %v3321_v17  ;;  %1334 = vmatprep.mubr.bf16.mxu1 %v3321_v17 }
 0x5bc   :  { %1264 = vmatpush1.bf16.msra.mxu0 %v2428_v8  ;;  %1305 = vmatpush1.bf16.msra.mxu1 %v2433_v9  ;;  %v3324_v8 = vld [vmem:[#allocation4_spill] sm:$0xff] }
 0x5bd   :  { %1265 = vmatprep.subr.bf16.mxu0 %v2440_v11  ;;  %1306 = vmatprep.subr.bf16.mxu1 %v2445_v12 }
 0x5c0   :  { %1266 = vmatpush1.bf16.msra.mxu0 %v2454_v18  ;;  %1307 = vmatpush1.bf16.msra.mxu1 %v2459_v19 }
 0x5c1   :  { %1267 = vmatprep.subr.bf16.mxu0 %v2466_v21  ;;  %1308 = vmatprep.subr.bf16.mxu1 %v2471_v22 }
 0x5c4   :  { %1268 = vmatpush1.bf16.msra.mxu0 %v2480_v23  ;;  %1309 = vmatpush1.bf16.msra.mxu1 %v2485_v24 }
 0x5c5   :  { %1269 = vmatprep.subr.bf16.mxu0 %v2492_v25  ;;  %1310 = vmatprep.subr.bf16.mxu1 %v2497_v26 }
 0x5c8   :  { %1270 = vmatpush1.bf16.msra.mxu0 %v2506_v30  ;;  %1311 = vmatpush1.bf16.msra.mxu1 %v2511_v31 }
 0x5c9   :  { %1271 = vmatprep.subr.bf16.mxu0 %v2518_v32  ;;  %1312 = vmatprep.subr.bf16.mxu1 %v2523_v33 }
 0x5cc   :  { %1272 = vmatpush1.bf16.msra.mxu0 %v2532_v34  ;;  %1313 = vmatpush1.bf16.msra.mxu1 %v2537_v35 }
 0x5cd   :  { %1273 = vmatprep.subr.bf16.mxu0 %v2544_v36  ;;  %1314 = vmatprep.subr.bf16.mxu1 %v2549_v37 }
 0x5d0   :  { %1274 = vmatpush1.bf16.msra.mxu0 %v2558_v38  ;;  %1315 = vmatpush1.bf16.msra.mxu1 %v2563_v39 }
 0x5d1   :  { %1275 = vmatprep.subr.bf16.mxu0 %v2570_v40  ;;  %1316 = vmatprep.subr.bf16.mxu1 %v2575_v41 }
 0x5d4   :  { %1276 = vmatpush1.bf16.msra.mxu0 %v2584_v42  ;;  %1317 = vmatpush1.bf16.msra.mxu1 %v2589_v43 }
 0x5d5   :  { %1378 = vmatprep.subr.bf16.mxu0 %v2883_v59  ;;  %1419 = vmatprep.subr.bf16.mxu1 %v2889_v60 }
 0x68a   :  { %v1178_v0 = vpop.f32.mrb[28].mxu0  ;;  %v1219_v1 = vpop.f32.mrb[44].mxu1 }
 0x68b   :  { %v1226_v9 = vadd.f32 %v1178_v0, %v3324_v8  ;;  %v1228_v27 = vadd.f32 %v1219_v1, %v3325_v3  ;;  %v1180_v44 = vpop.f32.mrb[29].mxu0  ;;  %v1221_v29 = vpop.f32.mrb[45].mxu1 }
 0x68c   :  { %v1227_v15 = vadd.f32 %v1180_v44, %v3326_v10  ;;  %v1182_v4 = vpop.f32.mrb[30].mxu0  ;;  %v1223_v13 = vpop.f32.mrb[46].mxu1  ;;  %v1245_v63 = vadd.f32 %v2718_v47, %v1221_v29 }
 0x68d   :  { %v1231_v14 = vsub.f32 0.0, %v1228_v27  ;;  %v1183_v16 = vpop.f32.mrb[31].mxu0  ;;  %v1224_v45 = vpop.f32.mrb[47].mxu1  ;;  %v1229_v50 = vsub.f32 0.0, %v1226_v9 }
 0x68e   :  { %v1230_v6 = vsub.f32 0.0, %v1227_v15  ;;  %v2928_v16 = vld [vmem:[%s3288_s6 + $0x24] ss:$16 sps:$4 sm:$0xff]   ;;  %v2934_v45 = vld [vmem:[%s3288_s6 + $0x2c] ss:$16 sps:$4 sm:$0xff]  }
 0x68f   :  { %v1236_v46 = vmul.f32 1.442695, %v1231_v14  ;;  %v1232_v62 = vmul.f32 1.442695, %v1229_v50  ;;  %v2922_v14 = vld [vmem:[%s3288_s6 + $0x8] ss:$16 sps:$4 sm:$0xff]  }
 0x690   :  { %v1234_v54 = vmul.f32 1.442695, %v1230_v6  ;;  %v2948_v50 = vld [vmem:[%s3288_s6 + $0x28] ss:$16 sps:$4 sm:$0xff]  }
 0x691   :  { %2123 = vpow2.f32 %v1236_v46  ;;  %v2942_v46 = vld [vmem:[%s3288_s6 + $0x20] ss:$16 sps:$4 sm:$0xff]  }
 0x692   :  { %2125 = vpow2.f32 %v1232_v62 }
 0x69b   :  { %v2124_v51 = vpop.eup %2123 }
 0x69c   :  { %v1240_v56 = vadd.f32 1.0, %v2124_v51  ;;  %v2126_v58 = vpop.eup %2125 }
 0x69d   :  { %v1238_v55 = vadd.f32 1.0, %v2126_v58 }
 0x69e   :  { %2127 = vrcp.f32 %v1240_v56 }
 0x69f   :  { %2129 = vpow2.f32 %v1234_v54 }
 0x6a8   :  { %v2128_v53 = vpop.eup %2127 }
 0x6a9   :  { %v2130_v2 = vpop.eup %2129  ;;  %v1244_v5 = vsel %vm632_vm3, 1.0, %v2128_v53  ;;  %v3331_v53 = vld [vmem:[#allocation11_spill] sm:$0xff] }
 0x6aa   :  { %v1246_v52 = vmul.f32 %v1245_v63, %v1244_v5  ;;  %v1239_v28 = vadd.f32 1.0, %v2130_v2 }
 0x6ac   :  { %v1247_v48 = vadd.f32 %v1246_v52, %v3327_v7 }
 0x6ae   :  { %2131 = vtanh.f32 %v1247_v48 }
 0x6af   :  { %2133 = vrcp.f32 %v1238_v55 }
 0x6b0   :  { %2135 = vrcp.f32 %v1239_v28 }
 0x6b8   :  { %v2132_v61 = vpop.eup %2131 }
 0x6b9   :  { %v2134_v0 = vpop.eup %2133  ;;  %v1249_v1 = vsel %vm632_vm3, %v2132_v61, %v2839_v20  ;;  %v1256_v8 = vsub.f32 %v2844_v49, %v2132_v61  ;;  %v2916_v49 = vld [vmem:[%s3288_s6] ss:$16 sps:$4 sm:$0xff]  }
 0x6ba   :  { %v2136_v9 = vpop.eup %2135  ;;  %v1250_v3 = vmul.f32 %v2134_v0, %v1249_v1 }
 0x6bb   :  { %v1257_v27 = vmul.f32 %v2136_v9, %v1256_v8 }
 0x6bc   :  { %1251 = vrot.lane.b32.xlu1 %v1250_v3, %s2237_s14 }
 0x6bd   :  { %v1258_v44 = vadd.f32 %v2132_v61, %v1257_v27 }
 0x72e   :  { %v1252_v29 = vpop.permute.xlu1 %1251 }
 0x72f   :  { %v2904_v10 = vadd.f32 %v1252_v29, %v1250_v3  ;;  %v3015_v29 = vld [vmem:[%s3288_s6 + $0x4c] ss:$16 sps:$4 sm:$0xff]  }
 0x731   :  { %2137 = vtanh.f32 %v2904_v10 }
 0x73b   :  { %v2138_v15 = vpop.eup %2137 }
 0x73c   :  { %v1255_v4 = vmul.f32 %v2138_v15, %v2136_v9  ;;  %v3027_v15 = vld [vmem:[%s3288_s6 + $0x48] ss:$16 sps:$4 sm:$0xff]  }
 0x73e   :  { %v2909_v13 = vsel %vm632_vm3, %v1255_v4, %v1258_v44  ;;  %v3009_v44 = vld [vmem:[%s3288_s6 + $0x44] ss:$16 sps:$4 sm:$0xff]  }
 0x73f   :  { %v1260_v20 = vpack.c.bf16 %v2909_v13, %v2909_v13  ;;  %v3033_v4 = vld [vmem:[%s3288_s6 + $0x64] ss:$16 sps:$4 sm:$0xff]  }
 0x741   :  { %1294 = vmatmul.mubr.bf16.vlgmr.msra.gmra.mrb[32].mxu0 %v1260_v20  ;;  %1335 = vmatmul.mubr.bf16.vlgmr.msra.gmra.mrb[48].mxu1 %v1260_v20  ;;  %v3045_v20 = vld [vmem:[%s3288_s6 + $0x60] ss:$16 sps:$4 sm:$0xff]  }
 0x742   :  { %1379 = vmatpush1.bf16.msra.mxu0 %v2916_v49  ;;  %1420 = vmatpush1.bf16.msra.mxu1 %v2922_v14 }
 0x743   :  { %1380 = vmatprep.subr.bf16.mxu0 %v2928_v16  ;;  %1421 = vmatprep.subr.bf16.mxu1 %v2934_v45 }
 0x744   :  { %1410 = vmatprep.mubr.bf16.mxu0 %v3321_v17  ;;  %1451 = vmatprep.mubr.bf16.mxu1 %v3321_v17 }
 0x746   :  { %1381 = vmatpush1.bf16.msra.mxu0 %v2942_v46  ;;  %1422 = vmatpush1.bf16.msra.mxu1 %v2948_v50 }
 0x747   :  { %1382 = vmatprep.subr.bf16.mxu0 %v2440_v11  ;;  %1423 = vmatprep.subr.bf16.mxu1 %v2445_v12 }
 0x74a   :  { %1383 = vmatpush1.bf16.msra.mxu0 %v2454_v18  ;;  %1424 = vmatpush1.bf16.msra.mxu1 %v2459_v19  ;;  %v3328_v18 = vld [vmem:[#allocation8_spill] sm:$0xff] }
 0x74b   :  { %1384 = vmatprep.subr.bf16.mxu0 %v2466_v21  ;;  %1425 = vmatprep.subr.bf16.mxu1 %v2471_v22  ;;  %v3329_v21 = vld [vmem:[#allocation9_spill] sm:$0xff] }
 0x74e   :  { %1385 = vmatpush1.bf16.msra.mxu0 %v2480_v23  ;;  %1426 = vmatpush1.bf16.msra.mxu1 %v2485_v24 }
 0x74f   :  { %1386 = vmatprep.subr.bf16.mxu0 %v2492_v25  ;;  %1427 = vmatprep.subr.bf16.mxu1 %v2497_v26  ;;  %v3330_v25 = vld [vmem:[#allocation10_spill] sm:$0xff] }
 0x752   :  { %1387 = vmatpush1.bf16.msra.mxu0 %v2506_v30  ;;  %1428 = vmatpush1.bf16.msra.mxu1 %v2511_v31 }
 0x753   :  { %1388 = vmatprep.subr.bf16.mxu0 %v2518_v32  ;;  %1429 = vmatprep.subr.bf16.mxu1 %v2523_v33 }
 0x756   :  { %1389 = vmatpush1.bf16.msra.mxu0 %v2532_v34  ;;  %1430 = vmatpush1.bf16.msra.mxu1 %v2537_v35 }
 0x757   :  { %1390 = vmatprep.subr.bf16.mxu0 %v2544_v36  ;;  %1431 = vmatprep.subr.bf16.mxu1 %v2549_v37 }
 0x75a   :  { %1391 = vmatpush1.bf16.msra.mxu0 %v2558_v38  ;;  %1432 = vmatpush1.bf16.msra.mxu1 %v2563_v39 }
 0x75b   :  { %1392 = vmatprep.subr.bf16.mxu0 %v2570_v40  ;;  %1433 = vmatprep.subr.bf16.mxu1 %v2575_v41 }
 0x75e   :  { %1393 = vmatpush1.bf16.msra.mxu0 %v2584_v42  ;;  %1434 = vmatpush1.bf16.msra.mxu1 %v2589_v43 }
 0x75f   :  { %1495 = vmatprep.subr.bf16.mxu0 %v2883_v59  ;;  %1536 = vmatprep.subr.bf16.mxu1 %v2889_v60 }
 0x814   :  { %v1295_v11 = vpop.f32.mrb[32].mxu0  ;;  %v1336_v12 = vpop.f32.mrb[48].mxu1 }
 0x815   :  { %v1343_v19 = vadd.f32 %v1295_v11, %v3328_v18  ;;  %v1345_v22 = vadd.f32 %v1336_v12, %v3329_v21  ;;  %v1297_v23 = vpop.f32.mrb[33].mxu0  ;;  %v1338_v24 = vpop.f32.mrb[49].mxu1  ;;  %v3051_v11 = vld [vmem:[%s3288_s6 + $0x68] ss:$16 sps:$4 sm:$0xff]   ;;  %v3057_v12 = vld [vmem:[%s3288_s6 + $0x84] ss:$16 sps:$4 sm:$0xff]  }
 0x816   :  { %v1344_v26 = vadd.f32 %v1297_v23, %v3330_v25  ;;  %v1299_v30 = vpop.f32.mrb[34].mxu0  ;;  %v1340_v31 = vpop.f32.mrb[50].mxu1  ;;  %v1362_v6 = vadd.f32 %v2718_v47, %v1338_v24  ;;  %v3063_v18 = vld [vmem:[%s3288_s6 + $0x8c] ss:$16 sps:$4 sm:$0xff]   ;;  %v3075_v21 = vld [vmem:[%s3288_s6 + $0x88] ss:$16 sps:$4 sm:$0xff]  }
 0x817   :  { %v1348_v32 = vsub.f32 0.0, %v1345_v22  ;;  %v1300_v33 = vpop.f32.mrb[35].mxu0  ;;  %v1341_v34 = vpop.f32.mrb[51].mxu1  ;;  %v1346_v36 = vsub.f32 0.0, %v1343_v19  ;;  %v3069_v19 = vld [vmem:[%s3288_s6 + $0x80] ss:$16 sps:$4 sm:$0xff]  }
 0x818   :  { %v1347_v37 = vsub.f32 0.0, %v1344_v26  ;;  %v3081_v22 = vld [vmem:[%s3288_s6 + $0xa4] ss:$16 sps:$4 sm:$0xff]   ;;  %v3087_v23 = vld [vmem:[%s3288_s6 + $0xac] ss:$16 sps:$4 sm:$0xff]  }
 0x819   :  { %v1353_v35 = vmul.f32 1.442695, %v1348_v32  ;;  %v1349_v38 = vmul.f32 1.442695, %v1346_v36  ;;  %v3093_v24 = vld [vmem:[%s3288_s6 + $0xa0] ss:$16 sps:$4 sm:$0xff]  }
 0x81a   :  { %v1351_v40 = vmul.f32 1.442695, %v1347_v37  ;;  %v3099_v25 = vld [vmem:[%s3288_s6 + $0xa8] ss:$16 sps:$4 sm:$0xff]   ;;  %v3105_v26 = vld [vmem:[%s3288_s6 + $0xc4] ss:$16 sps:$4 sm:$0xff]  }
 0x81b   :  { %2139 = vpow2.f32 %v1353_v35  ;;  %v3111_v30 = vld [vmem:[%s3288_s6 + $0xcc] ss:$16 sps:$4 sm:$0xff]   ;;  %v3117_v31 = vld [vmem:[%s3288_s6 + $0xc0] ss:$16 sps:$4 sm:$0xff]   ;;  %v3123_v32 = vld [vmem:[%s3288_s6 + $0xc8] ss:$16 sps:$4 sm:$0xff]  }
 0x81c   :  { %2141 = vpow2.f32 %v1349_v38  ;;  %v3129_v33 = vld [vmem:[%s3288_s6 + $0xe4] ss:$16 sps:$4 sm:$0xff]   ;;  %v3135_v34 = vld [vmem:[%s3288_s6 + $0xec] ss:$16 sps:$4 sm:$0xff]   ;;  %v3141_v35 = vld [vmem:[%s3288_s6 + $0xe0] ss:$16 sps:$4 sm:$0xff]  }
 0x81d   :  { %v3147_v36 = vld [vmem:[%s3288_s6 + $0xe8] ss:$16 sps:$4 sm:$0xff]  }
 0x825   :  { %v2140_v39 = vpop.eup %2139 }
 0x826   :  { %v1357_v41 = vadd.f32 1.0, %v2140_v39  ;;  %v2142_v42 = vpop.eup %2141  ;;  %v3332_v39 = vld [vmem:[#allocation12_spill] sm:$0xff] }
 0x827   :  { %v1355_v56 = vadd.f32 1.0, %v2142_v42 }
 0x828   :  { %2143 = vrcp.f32 %v1357_v41  ;;  %v3333_v41 = vld [vmem:[#allocation13_spill] sm:$0xff] }
 0x829   :  { %2145 = vpow2.f32 %v1351_v40 }
 0x832   :  { %v2144_v43 = vpop.eup %2143 }
 0x833   :  { %v2146_v62 = vpop.eup %2145  ;;  %v1361_v51 = vsel %vm632_vm3, 1.0, %v2144_v43 }
 0x834   :  { %v1363_v54 = vmul.f32 %v1362_v6, %v1361_v51  ;;  %v1356_v58 = vadd.f32 1.0, %v2146_v62  ;;  %v3334_v62 = vld [vmem:[#allocation14_spill] sm:$0xff] }
 0x836   :  { %v1364_v63 = vadd.f32 %v1363_v54, %v3331_v53 }
 0x838   :  { %2147 = vtanh.f32 %v1364_v63 }
 0x839   :  { %2149 = vrcp.f32 %v1355_v56 }
 0x83a   :  { %2151 = vrcp.f32 %v1356_v58 }
 0x842   :  { %v2148_v2 = vpop.eup %2147 }
 0x843   :  { %v2150_v5 = vpop.eup %2149  ;;  %v1366_v52 = vsel %vm632_vm3, %v2148_v2, %v2904_v10  ;;  %v1373_v55 = vsub.f32 %v2909_v13, %v2148_v2  ;;  %v3021_v10 = vld [vmem:[%s3288_s6 + $0x40] ss:$16 sps:$4 sm:$0xff]   ;;  %v3039_v13 = vld [vmem:[%s3288_s6 + $0x6c] ss:$16 sps:$4 sm:$0xff]  }
 0x844   :  { %v2152_v28 = vpop.eup %2151  ;;  %v1367_v7 = vmul.f32 %v2150_v5, %v1366_v52 }
 0x845   :  { %v1374_v48 = vmul.f32 %v2152_v28, %v1373_v55 }
 0x846   :  { %1368 = vrot.lane.b32.xlu0 %v1367_v7, %s2237_s14 }
 0x847   :  { %v1375_v61 = vadd.f32 %v2148_v2, %v1374_v48 }
 0x8b8   :  { %v1369_v0 = vpop.permute.xlu0 %1368 }
 0x8b9   :  { %v2989_v1 = vadd.f32 %v1369_v0, %v1367_v7 }
 0x8bb   :  { %2153 = vtanh.f32 %v2989_v1 }
 0x8c5   :  { %v2154_v8 = vpop.eup %2153 }
 0x8c6   :  { %v1372_v9 = vmul.f32 %v2154_v8, %v2152_v28 }
 0x8c8   :  { %v2994_v3 = vsel %vm632_vm3, %v1372_v9, %v1375_v61 }
 0x8c9   :  { %v1377_v27 = vpack.c.bf16 %v2994_v3, %v2994_v3 }
 0x8cb   :  { %1411 = vmatmul.mubr.bf16.vlgmr.msra.gmra.mrb[36].mxu0 %v1377_v27  ;;  %1452 = vmatmul.mubr.bf16.vlgmr.msra.gmra.mrb[52].mxu1 %v1377_v27 }
 0x8cc   :  { %1496 = vmatpush1.bf16.msra.mxu0 %v2916_v49  ;;  %1537 = vmatpush1.bf16.msra.mxu1 %v2922_v14 }
 0x8cd   :  { %1497 = vmatprep.subr.bf16.mxu0 %v2928_v16  ;;  %1538 = vmatprep.subr.bf16.mxu1 %v2934_v45 }
 0x8ce   :  { %1527 = vmatprep.mubr.bf16.mxu0 %v3321_v17  ;;  %1568 = vmatprep.mubr.bf16.mxu1 %v3321_v17 }
 0x8d0   :  { %1498 = vmatpush1.bf16.msra.mxu0 %v2942_v46  ;;  %1539 = vmatpush1.bf16.msra.mxu1 %v2948_v50 }
 0x8d1   :  { %1499 = vmatprep.subr.bf16.mxu0 %v3009_v44  ;;  %1540 = vmatprep.subr.bf16.mxu1 %v3015_v29 }
 0x8d4   :  { %1500 = vmatpush1.bf16.msra.mxu0 %v3021_v10  ;;  %1541 = vmatpush1.bf16.msra.mxu1 %v3027_v15 }
 0x8d5   :  { %1501 = vmatprep.subr.bf16.mxu0 %v3033_v4  ;;  %1542 = vmatprep.subr.bf16.mxu1 %v3039_v13 }
 0x8d8   :  { %1502 = vmatpush1.bf16.msra.mxu0 %v3045_v20  ;;  %1543 = vmatpush1.bf16.msra.mxu1 %v3051_v11 }
 0x8d9   :  { %1503 = vmatprep.subr.bf16.mxu0 %v3057_v12  ;;  %1544 = vmatprep.subr.bf16.mxu1 %v3063_v18 }
 0x8dc   :  { %1504 = vmatpush1.bf16.msra.mxu0 %v3069_v19  ;;  %1545 = vmatpush1.bf16.msra.mxu1 %v3075_v21 }
 0x8dd   :  { %1505 = vmatprep.subr.bf16.mxu0 %v3081_v22  ;;  %1546 = vmatprep.subr.bf16.mxu1 %v3087_v23 }
 0x8e0   :  { %1506 = vmatpush1.bf16.msra.mxu0 %v3093_v24  ;;  %1547 = vmatpush1.bf16.msra.mxu1 %v3099_v25 }
 0x8e1   :  { %1507 = vmatprep.subr.bf16.mxu0 %v3105_v26  ;;  %1548 = vmatprep.subr.bf16.mxu1 %v3111_v30 }
 0x8e4   :  { %1508 = vmatpush1.bf16.msra.mxu0 %v3117_v31  ;;  %1549 = vmatpush1.bf16.msra.mxu1 %v3123_v32 }
 0x8e5   :  { %1509 = vmatprep.subr.bf16.mxu0 %v3129_v33  ;;  %1550 = vmatprep.subr.bf16.mxu1 %v3135_v34 }
 0x8e8   :  { %1510 = vmatpush1.bf16.msra.mxu0 %v3141_v35  ;;  %1551 = vmatpush1.bf16.msra.mxu1 %v3147_v36 }
 0x8e9   :  { %1612 = vmatprep.subr.bf16.mxu0 %v2883_v59  ;;  %1653 = vmatprep.subr.bf16.mxu1 %v2889_v60 }
 0x99e   :  { %v1412_v37 = vpop.f32.mrb[36].mxu0  ;;  %v1453_v38 = vpop.f32.mrb[52].mxu1 }
 0x99f   :  { %v1460_v40 = vadd.f32 %v1412_v37, %v3332_v39  ;;  %v1462_v42 = vadd.f32 %v1453_v38, %v3333_v41  ;;  %v1414_v43 = vpop.f32.mrb[37].mxu0  ;;  %v1455_v6 = vpop.f32.mrb[53].mxu1  ;;  %v3335_v38 = vld [vmem:[#allocation15_spill] sm:$0xff] }
 0x9a0   :  { %v1461_v51 = vadd.f32 %v1414_v43, %v3334_v62  ;;  %v1416_v54 = vpop.f32.mrb[38].mxu0  ;;  %v1457_v56 = vpop.f32.mrb[54].mxu1  ;;  %v1479_v61 = vadd.f32 %v2718_v47, %v1455_v6 }
 0x9a1   :  { %v1465_v58 = vsub.f32 0.0, %v1462_v42  ;;  %v1417_v53 = vpop.f32.mrb[39].mxu0  ;;  %v1458_v63 = vpop.f32.mrb[55].mxu1  ;;  %v1463_v59 = vsub.f32 0.0, %v1460_v40 }
 0x9a2   :  { %v1464_v5 = vsub.f32 0.0, %v1461_v51 }
 0x9a3   :  { %v1470_v2 = vmul.f32 1.442695, %v1465_v58  ;;  %v1466_v60 = vmul.f32 1.442695, %v1463_v59 }
 0x9a4   :  { %v1468_v55 = vmul.f32 1.442695, %v1464_v5 }
 0x9a5   :  { %2155 = vpow2.f32 %v1470_v2 }
 0x9a6   :  { %2157 = vpow2.f32 %v1466_v60 }
 0x9af   :  { %v2156_v52 = vpop.eup %2155 }
 0x9b0   :  { %v1474_v28 = vadd.f32 1.0, %v2156_v52  ;;  %v2158_v7 = vpop.eup %2157 }
 0x9b1   :  { %v1472_v27 = vadd.f32 1.0, %v2158_v7 }
 0x9b2   :  { %2159 = vrcp.f32 %v1474_v28 }
 0x9b3   :  { %2161 = vpow2.f32 %v1468_v55 }
 0x9bc   :  { %v2160_v48 = vpop.eup %2159 }
 0x9bd   :  { %v2162_v0 = vpop.eup %2161  ;;  %v1478_v8 = vsel %vm632_vm3, 1.0, %v2160_v48 }
 0x9be   :  { %v1480_v9 = vmul.f32 %v1479_v61, %v1478_v8  ;;  %v1473_v37 = vadd.f32 1.0, %v2162_v0 }
 0x9c0   :  { %v1481_v39 = vadd.f32 %v1480_v9, %v3335_v38  ;;  %v2238_v38 = vmov 0.0  }
 0x9c2   :  { %2163 = vtanh.f32 %v1481_v39  ;;  %v2067_v39 = vld [vmem:[%s3292_s8] sm:$0xff]  }
 0x9c3   :  { %2165 = vrcp.f32 %v1472_v27 }
 0x9c4   :  { %2167 = vrcp.f32 %v1473_v37 }
 0x9cc   :  { %v2164_v40 = vpop.eup %2163 }
 0x9cd   :  { %v2166_v41 = vpop.eup %2165  ;;  %v1483_v42 = vsel %vm632_vm3, %v2164_v40, %v2989_v1  ;;  %v1490_v47 = vsub.f32 %v2994_v3, %v2164_v40 }
 0x9ce   :  { %v2168_v43 = vpop.eup %2167  ;;  %v1484_v6 = vmul.f32 %v2166_v41, %v1483_v42  ;;  %v2069_v41 = vld [vmem:[%s3292_s8 + $0x10] sm:$0xff]   ;;  %v2070_v42 = vld [vmem:[%s3292_s8 + $0x18] sm:$0xff]  }
 0x9cf   :  { %v1491_v62 = vmul.f32 %v2168_v43, %v1490_v47 }
 0x9d0   :  { %1485 = vrot.lane.b32.xlu1 %v1484_v6, %s2237_s14 }
 0x9d1   :  { %v1492_v51 = vadd.f32 %v2164_v40, %v1491_v62  ;;  %v2068_v40 = vld [vmem:[%s3292_s8 + $0x8] sm:$0xff]  }
 0xa42   :  { %v1486_v54 = vpop.permute.xlu1 %1485 }
 0xa43   :  { %v3164_v56 = vadd.f32 %v1486_v54, %v1484_v6  ;;  %v3340_v6 = vld [vmem:[#allocation20_spill] sm:$0xff] }
 0xa45   :  { %2169 = vtanh.f32 %v3164_v56 }
 0xa4f   :  { %v2170_v58 = vpop.eup %2169 }
 0xa50   :  { %v1489_v53 = vmul.f32 %v2170_v58, %v2168_v43 }
 0xa52   :  { %v3169_v63 = vsel %vm632_vm3, %v1489_v53, %v1492_v51  ;;  %v3341_v51 = vld [vmem:[#allocation21_spill] sm:$0xff]  ;;  %v3342_v53 = vld [vmem:[#allocation22_spill] sm:$0xff] }
 0xa53   :  { %v1494_v1 = vpack.c.bf16 %v3169_v63, %v3169_v63 }
 0xa55   :  { %1528 = vmatmul.mubr.bf16.vlgmr.msra.gmra.mrb[40].mxu0 %v1494_v1  ;;  %1569 = vmatmul.mubr.bf16.vlgmr.msra.gmra.mrb[56].mxu1 %v1494_v1 }
 0xa56   :  { %1613 = vmatpush1.bf16.msra.mxu0 %v2916_v49  ;;  %1654 = vmatpush1.bf16.msra.mxu1 %v2922_v14  ;;  %v3336_v14 = vld [vmem:[#allocation16_spill] sm:$0xff] }
 0xa57   :  { %1614 = vmatprep.subr.bf16.mxu0 %v2928_v16  ;;  %1655 = vmatprep.subr.bf16.mxu1 %v2934_v45  ;;  %v3337_v45 = vld [vmem:[#allocation17_spill] sm:$0xff] }
 0xa58   :  { %1644 = vmatprep.mubr.bf16.mxu0 %v3321_v17  ;;  %1685 = vmatprep.mubr.bf16.mxu1 %v3321_v17 }
 0xa5a   :  { %1615 = vmatpush1.bf16.msra.mxu0 %v2942_v46  ;;  %1656 = vmatpush1.bf16.msra.mxu1 %v2948_v50 }
 0xa5b   :  { %1616 = vmatprep.subr.bf16.mxu0 %v3009_v44  ;;  %1657 = vmatprep.subr.bf16.mxu1 %v3015_v29  ;;  %v3338_v44 = vld [vmem:[#allocation18_spill] sm:$0xff] }
 0xa5e   :  { %1617 = vmatpush1.bf16.msra.mxu0 %v3021_v10  ;;  %1658 = vmatpush1.bf16.msra.mxu1 %v3027_v15 }
 0xa5f   :  { %1618 = vmatprep.subr.bf16.mxu0 %v3033_v4  ;;  %1659 = vmatprep.subr.bf16.mxu1 %v3039_v13 }
 0xa62   :  { %1619 = vmatpush1.bf16.msra.mxu0 %v3045_v20  ;;  %1660 = vmatpush1.bf16.msra.mxu1 %v3051_v11 }
 0xa63   :  { %1620 = vmatprep.subr.bf16.mxu0 %v3057_v12  ;;  %1661 = vmatprep.subr.bf16.mxu1 %v3063_v18 }
 0xa66   :  { %1621 = vmatpush1.bf16.msra.mxu0 %v3069_v19  ;;  %1662 = vmatpush1.bf16.msra.mxu1 %v3075_v21 }
 0xa67   :  { %1622 = vmatprep.subr.bf16.mxu0 %v3081_v22  ;;  %1663 = vmatprep.subr.bf16.mxu1 %v3087_v23 }
 0xa6a   :  { %1623 = vmatpush1.bf16.msra.mxu0 %v3093_v24  ;;  %1664 = vmatpush1.bf16.msra.mxu1 %v3099_v25 }
 0xa6b   :  { %1624 = vmatprep.subr.bf16.mxu0 %v3105_v26  ;;  %1665 = vmatprep.subr.bf16.mxu1 %v3111_v30  ;;  %v3211_v26 = vld [vmem:[%s3291_s7] ss:$0 sm:$0xff] }
 0xa6e   :  { %1625 = vmatpush1.bf16.msra.mxu0 %v3117_v31  ;;  %1666 = vmatpush1.bf16.msra.mxu1 %v3123_v32 }
 0xa6f   :  { %1626 = vmatprep.subr.bf16.mxu0 %v3129_v33  ;;  %1667 = vmatprep.subr.bf16.mxu1 %v3135_v34 }
 0xa72   :  { %1627 = vmatpush1.bf16.msra.mxu0 %v3141_v35  ;;  %1668 = vmatpush1.bf16.msra.mxu1 %v3147_v36  ;;  %v3339_v36 = vld [vmem:[#allocation19_spill] sm:$0xff] }
 0xa73   :  { %1959 = vmatprep.subr.bf16.mxu0 %v2238_v38 }
 0xb28   :  { %v1529_v17 = vpop.f32.mrb[40].mxu0  ;;  %v1570_v49 = vpop.f32.mrb[56].mxu1 }
 0xb29   :  { %v1577_v16 = vadd.f32 %v1529_v17, %v3336_v14  ;;  %v1579_v46 = vadd.f32 %v1570_v49, %v3337_v45  ;;  %v1531_v50 = vpop.f32.mrb[41].mxu0  ;;  %v1572_v3 = vpop.f32.mrb[57].mxu1 }
 0xb2a   :  { %v1578_v29 = vadd.f32 %v1531_v50, %v3338_v44  ;;  %v1533_v10 = vpop.f32.mrb[42].mxu0  ;;  %v1574_v15 = vpop.f32.mrb[58].mxu1  ;;  %v1596_v30 = vadd.f32 %v3211_v26, %v1572_v3 }
 0xb2b   :  { %v1582_v4 = vsub.f32 0.0, %v1579_v46  ;;  %v1534_v13 = vpop.f32.mrb[43].mxu0  ;;  %v1575_v20 = vpop.f32.mrb[59].mxu1  ;;  %v1580_v12 = vsub.f32 0.0, %v1577_v16 }
 0xb2c   :  { %v1581_v18 = vsub.f32 0.0, %v1578_v29 }
 0xb2d   :  { %v1587_v11 = vmul.f32 1.442695, %v1582_v4  ;;  %v1583_v19 = vmul.f32 1.442695, %v1580_v12 }
 0xb2e   :  { %v1585_v22 = vmul.f32 1.442695, %v1581_v18 }
 0xb2f   :  { %2171 = vpow2.f32 %v1587_v11 }
 0xb30   :  { %2173 = vpow2.f32 %v1583_v19 }
 0xb39   :  { %v2172_v21 = vpop.eup %2171 }
 0xb3a   :  { %v1591_v23 = vadd.f32 1.0, %v2172_v21  ;;  %v2174_v24 = vpop.eup %2173  ;;  %v3343_v21 = vld [vmem:[#allocation23_spill] sm:$0xff] }
 0xb3b   :  { %v1589_v34 = vadd.f32 1.0, %v2174_v24  ;;  %v2072_v24 = vld [vmem:[%s3292_s8 + $0x28] sm:$0xff]  }
 0xb3c   :  { %2175 = vrcp.f32 %v1591_v23  ;;  %v2071_v23 = vld [vmem:[%s3292_s8 + $0x20] sm:$0xff]  }
 0xb3d   :  { %2177 = vpow2.f32 %v1585_v22 }
 0xb46   :  { %v2176_v25 = vpop.eup %2175 }
 0xb47   :  { %v2178_v31 = vpop.eup %2177  ;;  %v1595_v32 = vsel %vm632_vm3, 1.0, %v2176_v25 }
 0xb48   :  { %v1597_v33 = vmul.f32 %v1596_v30, %v1595_v32  ;;  %v1590_v35 = vadd.f32 1.0, %v2178_v31 }
 0xb4a   :  { %v1598_v2 = vadd.f32 %v1597_v33, %v3339_v36  ;;  %v2074_v36 = vld [vmem:[%s3292_s8 + $0x38] sm:$0xff]  }
 0xb4c   :  { %2179 = vtanh.f32 %v1598_v2 }
 0xb4d   :  { %2181 = vrcp.f32 %v1589_v34 }
 0xb4e   :  { %2183 = vrcp.f32 %v1590_v35 }
 0xb56   :  { %v2180_v59 = vpop.eup %2179 }
 0xb57   :  { %v2182_v5 = vpop.eup %2181  ;;  %v1600_v60 = vsel %vm632_vm3, %v2180_v59, %v3164_v56  ;;  %v1607_v52 = vsub.f32 %v3169_v63, %v2180_v59 }
 0xb58   :  { %v2184_v55 = vpop.eup %2183  ;;  %v1601_v28 = vmul.f32 %v2182_v5, %v1600_v60 }
 0xb59   :  { %v1608_v7 = vmul.f32 %v2184_v55, %v1607_v52 }
 0xb5a   :  { %1602 = vrot.lane.b32.xlu0 %v1601_v28, %s2237_s14 }
 0xb5b   :  { %v1609_v48 = vadd.f32 %v2180_v59, %v1608_v7  ;;  %v1905_v7 = vld [vmem:[%s3293_s9] ss:$0 sm:$0xff] }
 0xbcc   :  { %v1603_v61 = vpop.permute.xlu0 %1602 }
 0xbcd   :  { %v3222_v0 = vadd.f32 %v1603_v61, %v1601_v28 }
 0xbcf   :  { %2185 = vtanh.f32 %v3222_v0 }
 0xbd9   :  { %v2186_v8 = vpop.eup %2185 }
 0xbda   :  { %v1606_v9 = vmul.f32 %v2186_v8, %v2184_v55 }
 0xbdc   :  { %v3227_v27 = vsel %vm632_vm3, %v1606_v9, %v1609_v48 }
 0xbdd   :  { %v1611_v37 = vpack.c.bf16 %v3227_v27, %v3227_v27 }
 0xbdf   :  { %1645 = vmatmul.mubr.bf16.vlgmr.msra.gmra.mrb[44].mxu0 %v1611_v37  ;;  %1686 = vmatmul.mubr.bf16.vlgmr.msra.gmra.mrb[60].mxu1 %v1611_v37 }
 0xbe0   :  { %1960 = vmatpush3.bf16.msra.mxu0 %v2067_v39  ;;  %1975 = vmatprep.mubr.msk.bf16.mxu0 %vm2239_vm4, %v2238_v38 }
 0xbe1   :  { %1961 = vmatprep.subr.bf16.mxu0 %v2238_v38 }
 0xbe4   :  { %1962 = vmatpush3.bf16.msra.mxu0 %v2068_v40 }
 0xbe5   :  { %1963 = vmatprep.subr.bf16.mxu0 %v2238_v38 }
 0xbe8   :  { %1964 = vmatpush3.bf16.msra.mxu0 %v2069_v41 }
 0xbe9   :  { %1965 = vmatprep.subr.bf16.mxu0 %v2238_v38 }
 0xbec   :  { %1966 = vmatpush3.bf16.msra.mxu0 %v2070_v42 }
 0xbed   :  { %1967 = vmatprep.subr.bf16.mxu0 %v2238_v38 }
 0xbf0   :  { %1968 = vmatpush3.bf16.msra.mxu0 %v2071_v23 }
 0xbf1   :  { %1969 = vmatprep.subr.bf16.mxu0 %v2238_v38 }
 0xbf4   :  { %1970 = vmatpush3.bf16.msra.mxu0 %v2072_v24 }
 0xbf5   :  { %1971 = vmatprep.subr.bf16.mxu0 %v2238_v38 }
 0xcb2   :  { %v1646_v47 = vpop.f32.mrb[44].mxu0  ;;  %v1687_v43 = vpop.f32.mrb[60].mxu1 }
 0xcb3   :  { %v1694_v62 = vadd.f32 %v1646_v47, %v3340_v6  ;;  %v1696_v54 = vadd.f32 %v1687_v43, %v3341_v51  ;;  %v1648_v56 = vpop.f32.mrb[45].mxu0  ;;  %v1689_v58 = vpop.f32.mrb[61].mxu1 }
 0xcb4   :  { %v1695_v63 = vadd.f32 %v1648_v56, %v3342_v53  ;;  %v1650_v1 = vpop.f32.mrb[46].mxu0  ;;  %v1691_v17 = vpop.f32.mrb[62].mxu1  ;;  %v1713_v13 = vadd.f32 %v3211_v26, %v1689_v58  ;;  %v2073_v26 = vld [vmem:[%s3292_s8 + $0x30] sm:$0xff]  }
 0xcb5   :  { %v1699_v49 = vsub.f32 0.0, %v1696_v54  ;;  %v1651_v14 = vpop.f32.mrb[47].mxu0  ;;  %v1692_v16 = vpop.f32.mrb[63].mxu1  ;;  %v1697_v46 = vsub.f32 0.0, %v1694_v62  ;;  %1972 = vmatpush3.bf16.msra.mxu0 %v2073_v26 }
 0xcb6   :  { %v1698_v50 = vsub.f32 0.0, %v1695_v63  ;;  %1973 = vmatprep.subr.bf16.mxu0 %v2238_v38 }
 0xcb7   :  { %v1704_v45 = vmul.f32 1.442695, %v1699_v49  ;;  %v1700_v3 = vmul.f32 1.442695, %v1697_v46 }
 0xcb8   :  { %v1702_v29 = vmul.f32 1.442695, %v1698_v50 }
 0xcb9   :  { %2187 = vpow2.f32 %v1704_v45  ;;  %1974 = vmatpush3.bf16.msra.mxu0 %v2074_v36 }
 0xcba   :  { %2189 = vpow2.f32 %v1700_v3 }
 0xcc3   :  { %v2188_v44 = vpop.eup %2187 }
 0xcc4   :  { %v1708_v10 = vadd.f32 1.0, %v2188_v44  ;;  %v2190_v15 = vpop.eup %2189 }
 0xcc5   :  { %v1706_v18 = vadd.f32 1.0, %v2190_v15 }
 0xcc6   :  { %2191 = vrcp.f32 %v1708_v10 }
 0xcc7   :  { %2193 = vpow2.f32 %v1702_v29 }
 0xcd0   :  { %v2192_v4 = vpop.eup %2191 }
 0xcd1   :  { %v2194_v20 = vpop.eup %2193  ;;  %v1712_v11 = vsel %vm632_vm3, 1.0, %v2192_v4 }
 0xcd2   :  { %v1714_v12 = vmul.f32 %v1713_v13, %v1712_v11  ;;  %v1707_v19 = vadd.f32 1.0, %v2194_v20 }
 0xcd4   :  { %v1715_v22 = vadd.f32 %v1714_v12, %v3343_v21 }
 0xcd6   :  { %2195 = vtanh.f32 %v1715_v22 }
 0xcd7   :  { %2197 = vrcp.f32 %v1706_v18 }
 0xcd8   :  { %2199 = vrcp.f32 %v1707_v19 }
 0xce0   :  { %v2196_v25 = vpop.eup %2195 }
 0xce1   :  { %v2198_v30 = vpop.eup %2197  ;;  %v1717_v31 = vsel %vm632_vm3, %v2196_v25, %v3222_v0  ;;  %v1724_v32 = vsub.f32 %v3227_v27, %v2196_v25 }
 0xce2   :  { %v2200_v33 = vpop.eup %2199  ;;  %v1718_v34 = vmul.f32 %v2198_v30, %v1717_v31 }
 0xce3   :  { %v1725_v35 = vmul.f32 %v2200_v33, %v1724_v32 }
 0xce4   :  { %1719 = vrot.lane.b32.xlu1 %v1718_v34, %s2237_s14 }
 0xce5   :  { %v1726_v2 = vadd.f32 %v2196_v25, %v1725_v35 }
 0xd56   :  { %v1720_v59 = vpop.permute.xlu1 %1719 }
 0xd57   :  { %v1721_v5 = vadd.f32 %v1720_v59, %v1718_v34 }
 0xd59   :  { %2201 = vtanh.f32 %v1721_v5 }
 0xd63   :  { %v2202_v60 = vpop.eup %2201 }
 0xd64   :  { %v1723_v52 = vmul.f32 %v2202_v60, %v2200_v33 }
 0xd66   :  { %v1727_v55 = vsel %vm632_vm3, %v1723_v52, %v1726_v2 }
 0xd67   :  { %v1728_v28 = vpack.c.bf16 %v1727_v55, %v1727_v55 }
 0xd69   :  { %1976 = vmatmul.mubr.bf16.vlgmr.msra.gmra.mrb[48].mxu0 %v1728_v28 }
 0xe3c   :  { %v1818_v48 = vpop.f32.mrb[48].mxu0 }
 0xe3d   :  { %v1819_v61 = vadd.f32 %v1905_v7, %v1818_v48  ;;  %v1977_v0 = vpop.f32.mrb[49].mxu0 }
 0xe3e   :  { %v1821_v8 = vpop.f32.mrb[50].mxu0 }
 0xe3f   :  { %1824 = vst [vmem:[%s3294_s10] sm:$0xff] %v1819_v61  ;;  %v1978_v9 = vpop.f32.mrb[51].mxu0 }

</bundles_post_ra>
